<compile_context>
chip_gen: v7x
topology: tpu7x:2x2x1
jax: 0.10.0
libtpu: 0.0.40
codegen_flags: <defaults>
</compile_context>

<pallas_src>
import math

import jax
import jax.numpy as jnp
from jax.experimental import pallas as pl
from jax.experimental.pallas import tpu as pltpu  # noqa: F401  (TPU backend)

# ---------------- configuration (small test shapes) ----------------
L = 8              # seq_len
B = 2              # batch
D = 128            # d_model (lane-dense)
N_HEAD = 4
HEAD_DIM = D // N_HEAD
HIDDEN = 4 * D
LN_EPS = 1e-5
T = L * B          # total tokens in the fused slab


# ---------------- kernel helpers ----------------
def _layernorm(v, gamma, beta):
    # fp16-safe LayerNorm: compute in float32 over the last dim.
    v32 = v.astype(jnp.float32)
    mu = jnp.mean(v32, axis=-1, keepdims=True)
    var = jnp.mean((v32 - mu) ** 2, axis=-1, keepdims=True)
    return (v32 - mu) * jax.lax.rsqrt(var + LN_EPS) * gamma + beta


def _quick_gelu(v):
    return v * jax.nn.sigmoid(1.702 * v)


# ---------------- Pallas kernel (single invocation, everything in VMEM) ----------------
def adapter_block_kernel(
    x_ref,                 # (T, D)   tokens in sequence-first order: t = l*B + b
    g1_ref, b1_ref,        # (1, D)   ln_1
    wqkv_ref, bqkv_ref,    # (D, 3D), (1, 3D)  attn in_proj (pre-transposed)
    wo_ref, bo_ref,        # (D, D),  (1, D)   attn out_proj (pre-transposed)
    g2_ref, b2_ref,        # (1, D)   ln_2
    wfc_ref, bfc_ref,      # (D, 4D), (1, 4D)  mlp c_fc (pre-transposed)
    wpj_ref, bpj_ref,      # (4D, D), (1, D)   mlp c_proj (pre-transposed)
    o_ref,                 # (T, D)
):
    x = x_ref[...].astype(jnp.float32)

    # Additive batch mask: token t belongs to batch (t % B); cross-batch score
    # entries get -1e30 so softmax weights are exactly 0 there (equivalent to
    # independent per-batch attention; attn_type=None -> no causal mask).
    row_b = jax.lax.broadcasted_iota(jnp.int32, (T, T), 0) % B
    col_b = jax.lax.broadcasted_iota(jnp.int32, (T, T), 1) % B
    mask_bias = jnp.where(row_b == col_b, jnp.float32(0.0), jnp.float32(-1e30))

    # ---- ln_1 + fused QKV projection over all B*L tokens ----
    ln1 = _layernorm(x, g1_ref[...], b1_ref[...])
    qkv = jnp.dot(ln1, wqkv_ref[...], preferred_element_type=jnp.float32) + bqkv_ref[...]

    # ---- multi-head self-attention, heads statically unrolled;
    #      head-concat folded into the out-projection accumulation ----
    sm_scale = 1.0 / math.sqrt(HEAD_DIM)
    attn = jnp.zeros((T, D), jnp.float32)
    for h in range(N_HEAD):
        lo, hi = h * HEAD_DIM, (h + 1) * HEAD_DIM
        q = qkv[:, 0 * D + lo:0 * D + hi] * sm_scale     # (T, hd)
        k = qkv[:, 1 * D + lo:1 * D + hi]                # (T, hd)
        v = qkv[:, 2 * D + lo:2 * D + hi]                # (T, hd)
        s = jnp.dot(q, k.T, preferred_element_type=jnp.float32) + mask_bias  # (T, T)
        s = s - jnp.max(s, axis=-1, keepdims=True)
        p = jnp.exp(s)
        # Exact normalization (the denominator is only a (T,1) column; an
        # approximate EUP reciprocal here previously pushed the end-to-end
        # error above tolerance).
        p = p / jnp.sum(p, axis=-1, keepdims=True)
        oh = jnp.dot(p, v, preferred_element_type=jnp.float32)               # (T, hd)
        attn = attn + jnp.dot(oh, wo_ref[lo:hi, :], preferred_element_type=jnp.float32)
    x1 = x + attn + bo_ref[...]                          # residual 1

    # ---- ln_2 + MLP (c_fc -> QuickGELU -> c_proj) + residual ----
    ln2 = _layernorm(x1, g2_ref[...], b2_ref[...])
    h1 = _quick_gelu(
        jnp.dot(ln2, wfc_ref[...], preferred_element_type=jnp.float32) + bfc_ref[...])
    h2 = jnp.dot(h1, wpj_ref[...], preferred_element_type=jnp.float32) + bpj_ref[...]

    o_ref[...] = (x1 + h2).astype(o_ref.dtype)


# ---------------- wrapper ----------------
def adapter_trans_block(x, params):
    """x: (L, B, D) sequence-first (as nn.MultiheadAttention consumes) -> (L, B, D)."""
    Lx, Bx, Dx = x.shape
    # Free row-major merge of the leading dims (no transpose, no HBM copy).
    x2d = x.reshape(Lx * Bx, Dx)
    out2d = pl.pallas_call(
        adapter_block_kernel,
        out_shape=jax.ShapeDtypeStruct((Lx * Bx, Dx), x.dtype),
    )(
        x2d,
        params["g1"], params["b1"],
        params["wqkv_t"], params["bqkv"],
        params["wo_t"], params["bo"],
        params["g2"], params["b2"],
        params["wfc_t"], params["bfc"],
        params["wpj_t"], params["bpj"],
    )
    return out2d.reshape(Lx, Bx, Dx)


# ---------------- pure-JAX reference (mirrors the PyTorch forward) ----------------
def reference(x, p):
    def ln(v, g, b):
        v32 = v.astype(jnp.float32)
        mu = jnp.mean(v32, -1, keepdims=True)
        var = jnp.mean((v32 - mu) ** 2, -1, keepdims=True)
        return (v32 - mu) / jnp.sqrt(var + LN_EPS) * g + b

    qgelu = lambda v: v * jax.nn.sigmoid(1.702 * v)

    ln_x = ln(x, p["g1"][0], p["b1"][0])                      # (L, B, D)
    qkv = ln_x @ p["wqkv_t"] + p["bqkv"][0]                   # (L, B, 3D)
    q, k, v = qkv[..., :D], qkv[..., D:2 * D], qkv[..., 2 * D:]

    def heads(t):  # (L, B, D) -> (B, H, L, hd)
        return jnp.transpose(t.reshape(L, B, N_HEAD, HEAD_DIM), (1, 2, 0, 3))

    qh, kh, vh = heads(q), heads(k), heads(v)
    s = jnp.einsum("bhld,bhmd->bhlm", qh, kh) / math.sqrt(HEAD_DIM)
    pmat = jax.nn.softmax(s, axis=-1)
    o = jnp.einsum("bhlm,bhmd->bhld", pmat, vh)               # (B, H, L, hd)
    o = jnp.transpose(o, (2, 0, 1, 3)).reshape(L, B, D)
    attn = o @ p["wo_t"] + p["bo"][0]
    x1 = x + attn

    ln2 = ln(x1, p["g2"][0], p["b2"][0])
    h1 = qgelu(ln2 @ p["wfc_t"] + p["bfc"][0])
    return x1 + h1 @ p["wpj_t"] + p["bpj"][0]


# ---------------- deterministic parameter construction ----------------
def make_params(key):
    ks = jax.random.split(key, 10)
    attn_std = D ** -0.5
    proj_std = (2 * D) ** -0.5

    in_proj_w = jax.random.normal(ks[0], (3 * D, D), jnp.float32) * attn_std
    in_proj_b = jax.random.normal(ks[1], (3 * D,), jnp.float32) * 0.02
    out_proj_w = jax.random.normal(ks[2], (D, D), jnp.float32) * proj_std
    out_proj_b = jax.random.normal(ks[3], (D,), jnp.float32) * 0.02
    c_fc_w = jax.random.normal(ks[4], (HIDDEN, D), jnp.float32) * attn_std
    c_fc_b = jax.random.normal(ks[5], (HIDDEN,), jnp.float32) * 0.02
    c_proj_w = jax.random.normal(ks[6], (D, HIDDEN), jnp.float32) * proj_std
    c_proj_b = jax.random.normal(ks[7], (D,), jnp.float32) * 0.02

    def ln_params(k):
        kg, kb = jax.random.split(k)
        g = 1.0 + 0.1 * jax.random.normal(kg, (1, D), jnp.float32)
        b = 0.05 * jax.random.normal(kb, (1, D), jnp.float32)
        return g, b

    g1, b1 = ln_params(ks[8])
    g2, b2 = ln_params(ks[9])

    return {
        # pre-transposed weights + 2D biases for the kernel
        "g1": g1, "b1": b1,
        "wqkv_t": in_proj_w.T, "bqkv": in_proj_b[None, :],
        "wo_t": out_proj_w.T, "bo": out_proj_b[None, :],
        "g2": g2, "b2": b2,
        "wfc_t": c_fc_w.T, "bfc": c_fc_b[None, :],
        "wpj_t": c_proj_w.T, "bpj": c_proj_b[None, :],
    }


if __name__ == "__main__":
    key = jax.random.PRNGKey(0)
    kx, kp = jax.random.split(key)
    x = jax.random.normal(kx, (L, B, D), jnp.float32)   # (seq_len, batch, d_model)
    params = make_params(kp)

    out = jax.block_until_ready(adapter_trans_block(x, params))
    ref = reference(x, params)

    assert out.shape == (L, B, D), out.shape
    err = float(jnp.max(jnp.abs(out - ref)))
    # Exact f32 everywhere (incl. the softmax normalization) -> ~1e-5 max error.
    assert jnp.allclose(out, ref, atol=1e-3, rtol=1e-3), err
    print("KERNEL_OK")
</pallas_src>

<mosaic_0001>
module attributes {stable_mosaic.version = 11 : i64} {
  func.func @adapter_block_kernel(%arg0: memref<16x128xf32, #tpu.memory_space<vmem>>, %arg1: memref<1x128xf32, #tpu.memory_space<vmem>>, %arg2: memref<1x128xf32, #tpu.memory_space<vmem>>, %arg3: memref<128x384xf32, #tpu.memory_space<vmem>>, %arg4: memref<1x384xf32, #tpu.memory_space<vmem>>, %arg5: memref<128x128xf32, #tpu.memory_space<vmem>>, %arg6: memref<1x128xf32, #tpu.memory_space<vmem>>, %arg7: memref<1x128xf32, #tpu.memory_space<vmem>>, %arg8: memref<1x128xf32, #tpu.memory_space<vmem>>, %arg9: memref<128x512xf32, #tpu.memory_space<vmem>>, %arg10: memref<1x512xf32, #tpu.memory_space<vmem>>, %arg11: memref<512x128xf32, #tpu.memory_space<vmem>>, %arg12: memref<1x128xf32, #tpu.memory_space<vmem>>, %arg13: memref<16x128xf32, #tpu.memory_space<vmem>>) attributes {dimension_semantics = [], scalar_prefetch = 0 : i64, scratch_operands = 0 : i64, tpu.core_type = #tpu.core_type<tc>} {
    %c0 = arith.constant 0 : index
    %c0_0 = arith.constant 0 : index
    %0 = vector.load %arg0[%c0, %c0_0] : memref<16x128xf32, #tpu.memory_space<vmem>>, vector<16x128xf32>
    %1 = tpu.iota {dimensions = array<i32: 0>} : vector<16x16xi32>
    %c2_i32 = arith.constant 2 : i32
    %c0_i32 = arith.constant 0 : i32
    %2 = arith.cmpi eq, %c2_i32, %c0_i32 : i32
    %c1_i32 = arith.constant 1 : i32
    %3 = arith.select %2, %c1_i32, %c2_i32 : i32
    %4 = vector.broadcast %3 : i32 to vector<16x16xi32>
    %5 = arith.remsi %1, %4 : vector<16x16xi32>
    %c0_i32_1 = arith.constant 0 : i32
    %6 = vector.broadcast %c0_i32_1 : i32 to vector<16x16xi32>
    %7 = arith.cmpi ne, %5, %6 : vector<16x16xi32>
    %c0_i32_2 = arith.constant 0 : i32
    %8 = vector.broadcast %c0_i32_2 : i32 to vector<16x16xi32>
    %9 = arith.cmpi slt, %5, %8 : vector<16x16xi32>
    %c0_i32_3 = arith.constant 0 : i32
    %10 = arith.cmpi slt, %3, %c0_i32_3 : i32
    %11 = vector.broadcast %10 : i1 to vector<16x16xi1>
    %12 = vector.broadcast %11 : vector<16x16xi1> to vector<16x16xi1>
    %13 = arith.xori %9, %12 : vector<16x16xi1>
    %14 = arith.andi %13, %7 : vector<16x16xi1>
    %15 = vector.broadcast %3 : i32 to vector<16x16xi32>
    %16 = arith.addi %5, %15 : vector<16x16xi32>
    %17 = arith.select %14, %16, %5 : vector<16x16xi1>, vector<16x16xi32>
    %18 = tpu.iota {dimensions = array<i32: 1>} : vector<16x16xi32>
    %c2_i32_4 = arith.constant 2 : i32
    %c0_i32_5 = arith.constant 0 : i32
    %19 = arith.cmpi eq, %c2_i32_4, %c0_i32_5 : i32
    %c1_i32_6 = arith.constant 1 : i32
    %20 = arith.select %19, %c1_i32_6, %c2_i32_4 : i32
    %21 = vector.broadcast %20 : i32 to vector<16x16xi32>
    %22 = arith.remsi %18, %21 : vector<16x16xi32>
    %c0_i32_7 = arith.constant 0 : i32
    %23 = vector.broadcast %c0_i32_7 : i32 to vector<16x16xi32>
    %24 = arith.cmpi ne, %22, %23 : vector<16x16xi32>
    %c0_i32_8 = arith.constant 0 : i32
    %25 = vector.broadcast %c0_i32_8 : i32 to vector<16x16xi32>
    %26 = arith.cmpi slt, %22, %25 : vector<16x16xi32>
    %c0_i32_9 = arith.constant 0 : i32
    %27 = arith.cmpi slt, %20, %c0_i32_9 : i32
    %28 = vector.broadcast %27 : i1 to vector<16x16xi1>
    %29 = vector.broadcast %28 : vector<16x16xi1> to vector<16x16xi1>
    %30 = arith.xori %26, %29 : vector<16x16xi1>
    %31 = arith.andi %30, %24 : vector<16x16xi1>
    %32 = vector.broadcast %20 : i32 to vector<16x16xi32>
    %33 = arith.addi %22, %32 : vector<16x16xi32>
    %34 = arith.select %31, %33, %22 : vector<16x16xi1>, vector<16x16xi32>
    %35 = arith.cmpi eq, %17, %34 : vector<16x16xi32>
    %cst = arith.constant 0.000000e+00 : f32
    %cst_10 = arith.constant -1.000000e+30 : f32
    %36 = vector.broadcast %cst : f32 to vector<16x16xf32>
    %37 = vector.broadcast %cst_10 : f32 to vector<16x16xf32>
    %38 = arith.select %35, %36, %37 : vector<16x16xi1>, vector<16x16xf32>
    %c0_11 = arith.constant 0 : index
    %c0_12 = arith.constant 0 : index
    %39 = vector.load %arg1[%c0_11, %c0_12] : memref<1x128xf32, #tpu.memory_space<vmem>>, vector<1x128xf32>
    %c0_13 = arith.constant 0 : index
    %c0_14 = arith.constant 0 : index
    %40 = vector.load %arg2[%c0_13, %c0_14] : memref<1x128xf32, #tpu.memory_space<vmem>>, vector<1x128xf32>
    %cst_15 = arith.constant dense<0.000000e+00> : vector<16xf32>
    %41 = vector.multi_reduction <add>, %0, %cst_15 [1] : vector<16x128xf32> to vector<16xf32>
    %42 = vector.shape_cast %41 : vector<16xf32> to vector<16x1xf32>
    %cst_16 = arith.constant 1.280000e+02 : f32
    %43 = vector.broadcast %cst_16 : f32 to vector<16x1xf32>
    %44 = arith.divf %42, %43 : vector<16x1xf32>
    %45 = vector.broadcast %44 : vector<16x1xf32> to vector<16x128xf32>
    %46 = arith.subf %0, %45 : vector<16x128xf32>
    %47 = arith.mulf %46, %46 : vector<16x128xf32>
    %cst_17 = arith.constant dense<0.000000e+00> : vector<16xf32>
    %48 = vector.multi_reduction <add>, %47, %cst_17 [1] : vector<16x128xf32> to vector<16xf32>
    %49 = vector.shape_cast %48 : vector<16xf32> to vector<16x1xf32>
    %cst_18 = arith.constant 1.280000e+02 : f32
    %50 = vector.broadcast %cst_18 : f32 to vector<16x1xf32>
    %51 = arith.divf %49, %50 : vector<16x1xf32>
    %52 = vector.broadcast %44 : vector<16x1xf32> to vector<16x128xf32>
    %53 = arith.subf %0, %52 : vector<16x128xf32>
    %cst_19 = arith.constant 9.99999974E-6 : f32
    %54 = vector.broadcast %cst_19 : f32 to vector<16x1xf32>
    %55 = arith.addf %51, %54 : vector<16x1xf32>
    %56 = math.rsqrt %55 : vector<16x1xf32>
    %57 = vector.broadcast %56 : vector<16x1xf32> to vector<16x128xf32>
    %58 = arith.mulf %53, %57 : vector<16x128xf32>
    %59 = vector.broadcast %39 : vector<1x128xf32> to vector<16x128xf32>
    %60 = arith.mulf %58, %59 : vector<16x128xf32>
    %61 = vector.broadcast %40 : vector<1x128xf32> to vector<16x128xf32>
    %62 = arith.addf %60, %61 : vector<16x128xf32>
    %c0_20 = arith.constant 0 : index
    %c0_21 = arith.constant 0 : index
    %63 = vector.load %arg3[%c0_20, %c0_21] : memref<128x384xf32, #tpu.memory_space<vmem>>, vector<128x384xf32>
    %cst_22 = arith.constant dense<0.000000e+00> : vector<16x384xf32>
    %64 = tpu.matmul %62, %63, %cst_22 {dimension_numbers = #tpu.dot_dimension_numbers<[1], [0], [0], [1], [0, 0, 1, 1], [], []>} : vector<16x128xf32>, vector<128x384xf32>, vector<16x384xf32> -> vector<16x384xf32>
    %c0_23 = arith.constant 0 : index
    %c0_24 = arith.constant 0 : index
    %65 = vector.load %arg4[%c0_23, %c0_24] : memref<1x384xf32, #tpu.memory_space<vmem>>, vector<1x384xf32>
    %66 = vector.broadcast %65 : vector<1x384xf32> to vector<16x384xf32>
    %67 = arith.addf %64, %66 : vector<16x384xf32>
    %cst_25 = arith.constant 0.000000e+00 : f32
    %68 = vector.broadcast %cst_25 : f32 to vector<16x128xf32>
    %69 = vector.extract_strided_slice %67 {offsets = [0, 0], sizes = [16, 32], strides = [1, 1]} : vector<16x384xf32> to vector<16x32xf32>
    %cst_26 = arith.constant 0.176776692 : f32
    %70 = vector.broadcast %cst_26 : f32 to vector<16x32xf32>
    %71 = arith.mulf %69, %70 : vector<16x32xf32>
    %72 = vector.extract_strided_slice %67 {offsets = [0, 128], sizes = [16, 32], strides = [1, 1]} : vector<16x384xf32> to vector<16x32xf32>
    %73 = vector.extract_strided_slice %67 {offsets = [0, 256], sizes = [16, 32], strides = [1, 1]} : vector<16x384xf32> to vector<16x32xf32>
    %74 = tpu.transpose %72, [1, 0] : vector<16x32xf32> -> vector<32x16xf32>
    %cst_27 = arith.constant dense<0.000000e+00> : vector<16x16xf32>
    %75 = tpu.matmul %71, %74, %cst_27 {dimension_numbers = #tpu.dot_dimension_numbers<[1], [0], [0], [1], [0, 0, 1, 1], [], []>} : vector<16x32xf32>, vector<32x16xf32>, vector<16x16xf32> -> vector<16x16xf32>
    %76 = arith.addf %75, %38 : vector<16x16xf32>
    %cst_28 = arith.constant dense<0xFF800000> : vector<16xf32>
    %77 = vector.multi_reduction <maximumf>, %76, %cst_28 [1] : vector<16x16xf32> to vector<16xf32>
    %78 = vector.shape_cast %77 : vector<16xf32> to vector<16x1xf32>
    %79 = vector.broadcast %78 : vector<16x1xf32> to vector<16x16xf32>
    %80 = arith.subf %76, %79 : vector<16x16xf32>
    %81 = math.exp %80 : vector<16x16xf32>
    %cst_29 = arith.constant dense<0.000000e+00> : vector<16xf32>
    %82 = vector.multi_reduction <add>, %81, %cst_29 [1] : vector<16x16xf32> to vector<16xf32>
    %83 = vector.shape_cast %82 : vector<16xf32> to vector<16x1xf32>
    %84 = vector.broadcast %83 : vector<16x1xf32> to vector<16x16xf32>
    %85 = arith.divf %81, %84 : vector<16x16xf32>
    %cst_30 = arith.constant dense<0.000000e+00> : vector<16x32xf32>
    %86 = tpu.matmul %85, %73, %cst_30 {dimension_numbers = #tpu.dot_dimension_numbers<[1], [0], [0], [1], [0, 0, 1, 1], [], []>} : vector<16x16xf32>, vector<16x32xf32>, vector<16x32xf32> -> vector<16x32xf32>
    %c0_31 = arith.constant 0 : index
    %c0_32 = arith.constant 0 : index
    %87 = vector.load %arg5[%c0_31, %c0_32] : memref<128x128xf32, #tpu.memory_space<vmem>>, vector<32x128xf32>
    %cst_33 = arith.constant dense<0.000000e+00> : vector<16x128xf32>
    %88 = tpu.matmul %86, %87, %cst_33 {dimension_numbers = #tpu.dot_dimension_numbers<[1], [0], [0], [1], [0, 0, 1, 1], [], []>} : vector<16x32xf32>, vector<32x128xf32>, vector<16x128xf32> -> vector<16x128xf32>
    %89 = arith.addf %68, %88 : vector<16x128xf32>
    %90 = vector.extract_strided_slice %67 {offsets = [0, 32], sizes = [16, 32], strides = [1, 1]} : vector<16x384xf32> to vector<16x32xf32>
    %cst_34 = arith.constant 0.176776692 : f32
    %91 = vector.broadcast %cst_34 : f32 to vector<16x32xf32>
    %92 = arith.mulf %90, %91 : vector<16x32xf32>
    %93 = vector.extract_strided_slice %67 {offsets = [0, 160], sizes = [16, 32], strides = [1, 1]} : vector<16x384xf32> to vector<16x32xf32>
    %94 = vector.extract_strided_slice %67 {offsets = [0, 288], sizes = [16, 32], strides = [1, 1]} : vector<16x384xf32> to vector<16x32xf32>
    %95 = tpu.transpose %93, [1, 0] : vector<16x32xf32> -> vector<32x16xf32>
    %cst_35 = arith.constant dense<0.000000e+00> : vector<16x16xf32>
    %96 = tpu.matmul %92, %95, %cst_35 {dimension_numbers = #tpu.dot_dimension_numbers<[1], [0], [0], [1], [0, 0, 1, 1], [], []>} : vector<16x32xf32>, vector<32x16xf32>, vector<16x16xf32> -> vector<16x16xf32>
    %97 = arith.addf %96, %38 : vector<16x16xf32>
    %cst_36 = arith.constant dense<0xFF800000> : vector<16xf32>
    %98 = vector.multi_reduction <maximumf>, %97, %cst_36 [1] : vector<16x16xf32> to vector<16xf32>
    %99 = vector.shape_cast %98 : vector<16xf32> to vector<16x1xf32>
    %100 = vector.broadcast %99 : vector<16x1xf32> to vector<16x16xf32>
    %101 = arith.subf %97, %100 : vector<16x16xf32>
    %102 = math.exp %101 : vector<16x16xf32>
    %cst_37 = arith.constant dense<0.000000e+00> : vector<16xf32>
    %103 = vector.multi_reduction <add>, %102, %cst_37 [1] : vector<16x16xf32> to vector<16xf32>
    %104 = vector.shape_cast %103 : vector<16xf32> to vector<16x1xf32>
    %105 = vector.broadcast %104 : vector<16x1xf32> to vector<16x16xf32>
    %106 = arith.divf %102, %105 : vector<16x16xf32>
    %cst_38 = arith.constant dense<0.000000e+00> : vector<16x32xf32>
    %107 = tpu.matmul %106, %94, %cst_38 {dimension_numbers = #tpu.dot_dimension_numbers<[1], [0], [0], [1], [0, 0, 1, 1], [], []>} : vector<16x16xf32>, vector<16x32xf32>, vector<16x32xf32> -> vector<16x32xf32>
    %c32 = arith.constant 32 : index
    %c0_39 = arith.constant 0 : index
    %108 = vector.load %arg5[%c32, %c0_39] : memref<128x128xf32, #tpu.memory_space<vmem>>, vector<32x128xf32>
    %cst_40 = arith.constant dense<0.000000e+00> : vector<16x128xf32>
    %109 = tpu.matmul %107, %108, %cst_40 {dimension_numbers = #tpu.dot_dimension_numbers<[1], [0], [0], [1], [0, 0, 1, 1], [], []>} : vector<16x32xf32>, vector<32x128xf32>, vector<16x128xf32> -> vector<16x128xf32>
    %110 = arith.addf %89, %109 : vector<16x128xf32>
    %111 = vector.extract_strided_slice %67 {offsets = [0, 64], sizes = [16, 32], strides = [1, 1]} : vector<16x384xf32> to vector<16x32xf32>
    %cst_41 = arith.constant 0.176776692 : f32
    %112 = vector.broadcast %cst_41 : f32 to vector<16x32xf32>
    %113 = arith.mulf %111, %112 : vector<16x32xf32>
    %114 = vector.extract_strided_slice %67 {offsets = [0, 192], sizes = [16, 32], strides = [1, 1]} : vector<16x384xf32> to vector<16x32xf32>
    %115 = vector.extract_strided_slice %67 {offsets = [0, 320], sizes = [16, 32], strides = [1, 1]} : vector<16x384xf32> to vector<16x32xf32>
    %116 = tpu.transpose %114, [1, 0] : vector<16x32xf32> -> vector<32x16xf32>
    %cst_42 = arith.constant dense<0.000000e+00> : vector<16x16xf32>
    %117 = tpu.matmul %113, %116, %cst_42 {dimension_numbers = #tpu.dot_dimension_numbers<[1], [0], [0], [1], [0, 0, 1, 1], [], []>} : vector<16x32xf32>, vector<32x16xf32>, vector<16x16xf32> -> vector<16x16xf32>
    %118 = arith.addf %117, %38 : vector<16x16xf32>
    %cst_43 = arith.constant dense<0xFF800000> : vector<16xf32>
    %119 = vector.multi_reduction <maximumf>, %118, %cst_43 [1] : vector<16x16xf32> to vector<16xf32>
    %120 = vector.shape_cast %119 : vector<16xf32> to vector<16x1xf32>
    %121 = vector.broadcast %120 : vector<16x1xf32> to vector<16x16xf32>
    %122 = arith.subf %118, %121 : vector<16x16xf32>
    %123 = math.exp %122 : vector<16x16xf32>
    %cst_44 = arith.constant dense<0.000000e+00> : vector<16xf32>
    %124 = vector.multi_reduction <add>, %123, %cst_44 [1] : vector<16x16xf32> to vector<16xf32>
    %125 = vector.shape_cast %124 : vector<16xf32> to vector<16x1xf32>
    %126 = vector.broadcast %125 : vector<16x1xf32> to vector<16x16xf32>
    %127 = arith.divf %123, %126 : vector<16x16xf32>
    %cst_45 = arith.constant dense<0.000000e+00> : vector<16x32xf32>
    %128 = tpu.matmul %127, %115, %cst_45 {dimension_numbers = #tpu.dot_dimension_numbers<[1], [0], [0], [1], [0, 0, 1, 1], [], []>} : vector<16x16xf32>, vector<16x32xf32>, vector<16x32xf32> -> vector<16x32xf32>
    %c64 = arith.constant 64 : index
    %c0_46 = arith.constant 0 : index
    %129 = vector.load %arg5[%c64, %c0_46] : memref<128x128xf32, #tpu.memory_space<vmem>>, vector<32x128xf32>
    %cst_47 = arith.constant dense<0.000000e+00> : vector<16x128xf32>
    %130 = tpu.matmul %128, %129, %cst_47 {dimension_numbers = #tpu.dot_dimension_numbers<[1], [0], [0], [1], [0, 0, 1, 1], [], []>} : vector<16x32xf32>, vector<32x128xf32>, vector<16x128xf32> -> vector<16x128xf32>
    %131 = arith.addf %110, %130 : vector<16x128xf32>
    %132 = vector.extract_strided_slice %67 {offsets = [0, 96], sizes = [16, 32], strides = [1, 1]} : vector<16x384xf32> to vector<16x32xf32>
    %cst_48 = arith.constant 0.176776692 : f32
    %133 = vector.broadcast %cst_48 : f32 to vector<16x32xf32>
    %134 = arith.mulf %132, %133 : vector<16x32xf32>
    %135 = vector.extract_strided_slice %67 {offsets = [0, 224], sizes = [16, 32], strides = [1, 1]} : vector<16x384xf32> to vector<16x32xf32>
    %136 = vector.extract_strided_slice %67 {offsets = [0, 352], sizes = [16, 32], strides = [1, 1]} : vector<16x384xf32> to vector<16x32xf32>
    %137 = tpu.transpose %135, [1, 0] : vector<16x32xf32> -> vector<32x16xf32>
    %cst_49 = arith.constant dense<0.000000e+00> : vector<16x16xf32>
    %138 = tpu.matmul %134, %137, %cst_49 {dimension_numbers = #tpu.dot_dimension_numbers<[1], [0], [0], [1], [0, 0, 1, 1], [], []>} : vector<16x32xf32>, vector<32x16xf32>, vector<16x16xf32> -> vector<16x16xf32>
    %139 = arith.addf %138, %38 : vector<16x16xf32>
    %cst_50 = arith.constant dense<0xFF800000> : vector<16xf32>
    %140 = vector.multi_reduction <maximumf>, %139, %cst_50 [1] : vector<16x16xf32> to vector<16xf32>
    %141 = vector.shape_cast %140 : vector<16xf32> to vector<16x1xf32>
    %142 = vector.broadcast %141 : vector<16x1xf32> to vector<16x16xf32>
    %143 = arith.subf %139, %142 : vector<16x16xf32>
    %144 = math.exp %143 : vector<16x16xf32>
    %cst_51 = arith.constant dense<0.000000e+00> : vector<16xf32>
    %145 = vector.multi_reduction <add>, %144, %cst_51 [1] : vector<16x16xf32> to vector<16xf32>
    %146 = vector.shape_cast %145 : vector<16xf32> to vector<16x1xf32>
    %147 = vector.broadcast %146 : vector<16x1xf32> to vector<16x16xf32>
    %148 = arith.divf %144, %147 : vector<16x16xf32>
    %cst_52 = arith.constant dense<0.000000e+00> : vector<16x32xf32>
    %149 = tpu.matmul %148, %136, %cst_52 {dimension_numbers = #tpu.dot_dimension_numbers<[1], [0], [0], [1], [0, 0, 1, 1], [], []>} : vector<16x16xf32>, vector<16x32xf32>, vector<16x32xf32> -> vector<16x32xf32>
    %c96 = arith.constant 96 : index
    %c0_53 = arith.constant 0 : index
    %150 = vector.load %arg5[%c96, %c0_53] : memref<128x128xf32, #tpu.memory_space<vmem>>, vector<32x128xf32>
    %cst_54 = arith.constant dense<0.000000e+00> : vector<16x128xf32>
    %151 = tpu.matmul %149, %150, %cst_54 {dimension_numbers = #tpu.dot_dimension_numbers<[1], [0], [0], [1], [0, 0, 1, 1], [], []>} : vector<16x32xf32>, vector<32x128xf32>, vector<16x128xf32> -> vector<16x128xf32>
    %152 = arith.addf %131, %151 : vector<16x128xf32>
    %153 = arith.addf %0, %152 : vector<16x128xf32>
    %c0_55 = arith.constant 0 : index
    %c0_56 = arith.constant 0 : index
    %154 = vector.load %arg6[%c0_55, %c0_56] : memref<1x128xf32, #tpu.memory_space<vmem>>, vector<1x128xf32>
    %155 = vector.broadcast %154 : vector<1x128xf32> to vector<16x128xf32>
    %156 = arith.addf %153, %155 : vector<16x128xf32>
    %c0_57 = arith.constant 0 : index
    %c0_58 = arith.constant 0 : index
    %157 = vector.load %arg7[%c0_57, %c0_58] : memref<1x128xf32, #tpu.memory_space<vmem>>, vector<1x128xf32>
    %c0_59 = arith.constant 0 : index
    %c0_60 = arith.constant 0 : index
    %158 = vector.load %arg8[%c0_59, %c0_60] : memref<1x128xf32, #tpu.memory_space<vmem>>, vector<1x128xf32>
    %cst_61 = arith.constant dense<0.000000e+00> : vector<16xf32>
    %159 = vector.multi_reduction <add>, %156, %cst_61 [1] : vector<16x128xf32> to vector<16xf32>
    %160 = vector.shape_cast %159 : vector<16xf32> to vector<16x1xf32>
    %cst_62 = arith.constant 1.280000e+02 : f32
    %161 = vector.broadcast %cst_62 : f32 to vector<16x1xf32>
    %162 = arith.divf %160, %161 : vector<16x1xf32>
    %163 = vector.broadcast %162 : vector<16x1xf32> to vector<16x128xf32>
    %164 = arith.subf %156, %163 : vector<16x128xf32>
    %165 = arith.mulf %164, %164 : vector<16x128xf32>
    %cst_63 = arith.constant dense<0.000000e+00> : vector<16xf32>
    %166 = vector.multi_reduction <add>, %165, %cst_63 [1] : vector<16x128xf32> to vector<16xf32>
    %167 = vector.shape_cast %166 : vector<16xf32> to vector<16x1xf32>
    %cst_64 = arith.constant 1.280000e+02 : f32
    %168 = vector.broadcast %cst_64 : f32 to vector<16x1xf32>
    %169 = arith.divf %167, %168 : vector<16x1xf32>
    %170 = vector.broadcast %162 : vector<16x1xf32> to vector<16x128xf32>
    %171 = arith.subf %156, %170 : vector<16x128xf32>
    %cst_65 = arith.constant 9.99999974E-6 : f32
    %172 = vector.broadcast %cst_65 : f32 to vector<16x1xf32>
    %173 = arith.addf %169, %172 : vector<16x1xf32>
    %174 = math.rsqrt %173 : vector<16x1xf32>
    %175 = vector.broadcast %174 : vector<16x1xf32> to vector<16x128xf32>
    %176 = arith.mulf %171, %175 : vector<16x128xf32>
    %177 = vector.broadcast %157 : vector<1x128xf32> to vector<16x128xf32>
    %178 = arith.mulf %176, %177 : vector<16x128xf32>
    %179 = vector.broadcast %158 : vector<1x128xf32> to vector<16x128xf32>
    %180 = arith.addf %178, %179 : vector<16x128xf32>
    %c0_66 = arith.constant 0 : index
    %c0_67 = arith.constant 0 : index
    %181 = vector.load %arg9[%c0_66, %c0_67] : memref<128x512xf32, #tpu.memory_space<vmem>>, vector<128x512xf32>
    %cst_68 = arith.constant dense<0.000000e+00> : vector<16x512xf32>
    %182 = tpu.matmul %180, %181, %cst_68 {dimension_numbers = #tpu.dot_dimension_numbers<[1], [0], [0], [1], [0, 0, 1, 1], [], []>} : vector<16x128xf32>, vector<128x512xf32>, vector<16x512xf32> -> vector<16x512xf32>
    %c0_69 = arith.constant 0 : index
    %c0_70 = arith.constant 0 : index
    %183 = vector.load %arg10[%c0_69, %c0_70] : memref<1x512xf32, #tpu.memory_space<vmem>>, vector<1x512xf32>
    %184 = vector.broadcast %183 : vector<1x512xf32> to vector<16x512xf32>
    %185 = arith.addf %182, %184 : vector<16x512xf32>
    %cst_71 = arith.constant 1.702000e+00 : f32
    %186 = vector.broadcast %cst_71 : f32 to vector<16x512xf32>
    %187 = arith.mulf %186, %185 : vector<16x512xf32>
    %188 = arith.negf %187 : vector<16x512xf32>
    %189 = math.exp %188 : vector<16x512xf32>
    %cst_72 = arith.constant 1.000000e+00 : f32
    %190 = vector.broadcast %cst_72 : f32 to vector<16x512xf32>
    %191 = arith.addf %190, %189 : vector<16x512xf32>
    %192 = arith.divf %190, %191 : vector<16x512xf32>
    %193 = arith.mulf %185, %192 : vector<16x512xf32>
    %c0_73 = arith.constant 0 : index
    %c0_74 = arith.constant 0 : index
    %194 = vector.load %arg11[%c0_73, %c0_74] : memref<512x128xf32, #tpu.memory_space<vmem>>, vector<512x128xf32>
    %cst_75 = arith.constant dense<0.000000e+00> : vector<16x128xf32>
    %195 = tpu.matmul %193, %194, %cst_75 {dimension_numbers = #tpu.dot_dimension_numbers<[1], [0], [0], [1], [0, 0, 1, 1], [], []>} : vector<16x512xf32>, vector<512x128xf32>, vector<16x128xf32> -> vector<16x128xf32>
    %c0_76 = arith.constant 0 : index
    %c0_77 = arith.constant 0 : index
    %196 = vector.load %arg12[%c0_76, %c0_77] : memref<1x128xf32, #tpu.memory_space<vmem>>, vector<1x128xf32>
    %197 = vector.broadcast %196 : vector<1x128xf32> to vector<16x128xf32>
    %198 = arith.addf %195, %197 : vector<16x128xf32>
    %199 = arith.addf %156, %198 : vector<16x128xf32>
    %c0_78 = arith.constant 0 : index
    %c0_79 = arith.constant 0 : index
    %200 = vector.load %arg13[%c0_78, %c0_79] : memref<16x128xf32, #tpu.memory_space<vmem>>, vector<16x128xf32>
    tpu.vector_store %arg13[%c0_78, %c0_79], %199 {strides = array<i32>} : memref<16x128xf32, #tpu.memory_space<vmem>>, vector<16x128xf32>,
    return
  }
}

</mosaic_0001>

<bundles_post_ra>
// kernel: tpu_custom_call.1
= control target key start
LH: loop header
LB: loop body
LE: loop exit
PB: predicated region body
PF: predicated region fallthrough
CT: control target
= control target key end

     0   :  { %18 = vsyncpa [#allocation3], 0  ;;  %s3517_s0 = inlined_call_operand.hbm [shape: f32[16,128], index: 0, kind: input, shape index: {}]   ;;  %s3518_s1 = inlined_call_operand.hbm [shape: f32[1,128], index: 1, kind: input, shape index: {}]   ;;  %s3519_s2 = inlined_call_operand.hbm [shape: f32[1,128], index: 2, kind: input, shape index: {}]   ;;  %s3520_s3 = inlined_call_operand.hbm [shape: f32[128,384], index: 3, kind: input, shape index: {}]   ;;  %s3521_s4 = inlined_call_operand.vmem [shape: f32[1,384], index: 4, kind: input, shape index: {}]   ;;  %s3522_s5 = inlined_call_operand.hbm [shape: f32[128,128], index: 5, kind: input, shape index: {}]   ;;  %s3523_s6 = inlined_call_operand.vmem [shape: f32[1,128], index: 6, kind: input, shape index: {}]   ;;  %s3524_s7 = inlined_call_operand.vmem [shape: f32[1,128], index: 7, kind: input, shape index: {}]   ;;  %s3525_s8 = inlined_call_operand.vmem [shape: f32[1,128], index: 8, kind: input, shape index: {}]   ;;  %s3526_s9 = inlined_call_operand.hbm [shape: f32[128,512], index: 9, kind: input, shape index: {}]   ;;  %s3527_s10 = inlined_call_operand.vmem [shape: f32[1,512], index: 10, kind: input, shape index: {}]   ;;  %s3528_s11 = inlined_call_operand.hbm [shape: f32[512,128], index: 11, kind: input, shape index: {}]   ;;  %s3529_s12 = inlined_call_operand.vmem [shape: f32[1,128], index: 12, kind: input, shape index: {}]   ;;  %s3530_s13 = inlined_call_operand.hbm [shape: f32[16,128], index: 13, kind: output, shape index: {}]  }
   0x1   :  { %19 = vsyncpa [#allocation6], 0 }
   0x2   :  { %20 = vsyncpa [#allocation9], 0 }
   0x3   :  { %21 = vsyncpa [#allocation12], 0 }
   0x4   :  { %22 = vsyncpa [#allocation4], 0  ;;  %s3088_s25 = smov [#allocation5]   ;;  %s3089_s27 = smov [#allocation8]  }
   0x5   :  { %s41_s26 = sshll.u32 %s3088_s25, 4  ;;  %s60_s28 = sshll.u32 %s3089_s27, 4  ;;  %s42_s26 = int_to_ptr.vmem [resolvable:$true] %s41_s26  ;;  %s3176_s28 = int_to_ptr.vmem [resolvable:$true] %s60_s28 }
   0x6   :  { %s2902_s14 = scalar_lea.hbm %s3518_s1, 16 }
   0x7   :  { %p2903_p0 = scmp.ne.s32.totalorder %s3518_s1, %s2902_s14  ;;  %p2906_p1 = scmp.lt.u32.totalorder %s2902_s14, %s3518_s1 }
   0x9   :  { %p2908_p2 = pnand %p2906_p1, %p2903_p0 }
   0xb   :  { %2911 = shalt.err (!%p2908_p2)
}
   0xc   :  { %s2912_s19 = scalar_lea.vmem %s42_s26, 16  ;;  %s2916_s20 = scalar_lea.vmem %s42_s26, 32 }
   0xd   :  { %p2913_p3 = scmp.ne.s32.totalorder %s42_s26, %s2912_s19  ;;  %p2917_p4 = scmp.lt.s32.totalorder %s42_s26, %s42_s26 }
   0xe   :  { %p2918_p5 = scmp.lt.s32.totalorder %s2916_s20, %s2912_s19 }
  0x10   :  { %p2919_p6 = por %p2918_p5, %p2917_p4 }
  0x12   :  { %p2920_p7 = pnand %p2919_p6, %p2913_p3 }
  0x14   :  { %2923 = shalt.err (!%p2920_p7)
}
  0x15   :  { %44 = dma.hbm_to_vmem [thread:$0]  %s3518_s1, 16, %s42_s26, [#allocation6]  }
  0x16   :  { %s2924_s25 = scalar_lea.hbm %s3520_s3, 6144 }
  0x17   :  { %p2925_p8 = scmp.ne.s32.totalorder %s3520_s3, %s2924_s25  ;;  %p2928_p9 = scmp.lt.u32.totalorder %s2924_s25, %s3520_s3 }
  0x19   :  { %p2930_p10 = pnand %p2928_p9, %p2925_p8 }
  0x1b   :  { %2933 = shalt.err (!%p2930_p10)
}
  0x1c   :  { %s2934_s15 = scalar_lea.vmem %s3176_s28, 6144  ;;  %p2939_p12 = scmp.lt.s32.totalorder %s3176_s28, %s3176_s28 }
  0x1d   :  { %p2935_p11 = scmp.ne.s32.totalorder %s3176_s28, %s2934_s15  ;;  %p2940_p13 = scmp.lt.s32.totalorder %s2934_s15, %s2934_s15 }
  0x1f   :  { %p2941_p0 = por %p2940_p13, %p2939_p12 }
  0x21   :  { %p2942_p1 = pnand %p2941_p0, %p2935_p11 }
  0x23   :  { %2945 = shalt.err (!%p2942_p1)
}
  0x24   :  { %s3090_s1 = smov 384   ;;  %s3091_s26 = smov 24  }
  0x25   :  { %66 = dma.hbm_to_vmem [thread:$0]  %s3520_s3, 6144, %s3176_s28, [#allocation9], %s3090_s1, %s3090_s1, %s3091_s26  }
  0x26   :  { %s3092_s18 = smov [#allocation11]   ;;  %s2946_s22 = scalar_lea.hbm %s3526_s9, 8192 }
  0x27   :  { %s92_s19 = sshll.u32 %s3092_s18, 4  ;;  %p2947_p2 = scmp.ne.s32.totalorder %s3526_s9, %s2946_s22  ;;  %s93_s19 = int_to_ptr.vmem [resolvable:$true] %s92_s19 }
  0x28   :  { %p2950_p3 = scmp.lt.u32.totalorder %s2946_s22, %s3526_s9 }
  0x2a   :  { %p2952_p4 = pnand %p2950_p3, %p2947_p2 }
  0x2c   :  { %2955 = shalt.err (!%p2952_p4)
}
  0x2d   :  { %s2956_s29 = scalar_lea.vmem %s93_s19, 8192  ;;  %p2961_p6 = scmp.lt.s32.totalorder %s93_s19, %s93_s19 }
  0x2e   :  { %p2957_p5 = scmp.ne.s32.totalorder %s93_s19, %s2956_s29  ;;  %p2962_p7 = scmp.lt.s32.totalorder %s2956_s29, %s2956_s29 }
  0x30   :  { %p2963_p8 = por %p2962_p7, %p2961_p6 }
  0x32   :  { %p2964_p9 = pnand %p2963_p8, %p2957_p5 }
  0x34   :  { %2967 = shalt.err (!%p2964_p9)
}
  0x35   :  { %s3093_s3 = smov 512   ;;  %s3094_s28 = smov 32  }
  0x36   :  { %98 = dma.hbm_to_vmem [thread:$0]  %s3526_s9, 8192, %s93_s19, [#allocation12], %s3093_s3, %s3093_s3, %s3094_s28  }
  0x37   :  { %s3095_s15 = smov [#allocation2]   ;;  %s2968_s17 = scalar_lea.hbm %s3517_s0, 256 }
  0x38   :  { %s28_s1 = sshll.u32 %s3095_s15, 4  ;;  %p2969_p10 = scmp.ne.s32.totalorder %s3517_s0, %s2968_s17  ;;  %s29_s1 = int_to_ptr.vmem [resolvable:$true] %s28_s1 }
  0x39   :  { %p2972_p11 = scmp.lt.u32.totalorder %s2968_s17, %s3517_s0 }
  0x3b   :  { %p2974_p12 = pnand %p2972_p11, %p2969_p10 }
  0x3d   :  { %2977 = shalt.err (!%p2974_p12)
}
  0x3e   :  { %s2978_s23 = scalar_lea.vmem %s29_s1, 256  ;;  %p2983_p0 = scmp.lt.s32.totalorder %s29_s1, %s29_s1 }
  0x3f   :  { %p2979_p13 = scmp.ne.s32.totalorder %s29_s1, %s2978_s23  ;;  %p2984_p1 = scmp.lt.s32.totalorder %s2978_s23, %s2978_s23 }
  0x41   :  { %p2985_p2 = por %p2984_p1, %p2983_p0 }
  0x43   :  { %p2986_p3 = pnand %p2985_p2, %p2979_p13 }
  0x45   :  { %2989 = shalt.err (!%p2986_p3)
}
  0x46   :  { %s3096_s9 = smov 128   ;;  %s3097_s19 = smov 8  }
  0x47   :  { %34 = dma.hbm_to_vmem [thread:$0]  %s3517_s0, 256, %s29_s1, [#allocation3], %s3096_s9, %s3096_s9, %s3097_s19  }
  0x48   :  { %s3098_s27 = smov [#allocation7]   ;;  %s3099_s3 = smov [#allocation10]  }
  0x49   :  { %s51_s29 = sshll.u32 %s3098_s27, 4  ;;  %s74_s30 = sshll.u32 %s3099_s3, 4  ;;  %s52_s29 = int_to_ptr.vmem [resolvable:$true] %s51_s29  ;;  %s3235_s30 = int_to_ptr.vmem [resolvable:$true] %s74_s30 }
  0x4a   :  { %s2990_s26 = scalar_lea.hbm %s3519_s2, 16 }
  0x4b   :  { %p2991_p4 = scmp.ne.s32.totalorder %s3519_s2, %s2990_s26  ;;  %p2994_p5 = scmp.lt.u32.totalorder %s2990_s26, %s3519_s2 }
  0x4d   :  { %p2996_p6 = pnand %p2994_p5, %p2991_p4 }
  0x4f   :  { %2999 = shalt.err (!%p2996_p6)
}
  0x50   :  { %s3000_s0 = scalar_lea.vmem %s52_s29, 16  ;;  %s3004_s1 = scalar_lea.vmem %s52_s29, 32 }
  0x51   :  { %p3001_p7 = scmp.ne.s32.totalorder %s52_s29, %s3000_s0  ;;  %p3005_p8 = scmp.lt.s32.totalorder %s52_s29, %s52_s29 }
  0x52   :  { %p3006_p9 = scmp.lt.s32.totalorder %s3004_s1, %s3000_s0 }
  0x54   :  { %p3007_p10 = por %p3006_p9, %p3005_p8 }
  0x56   :  { %p3008_p11 = pnand %p3007_p10, %p3001_p7 }
  0x58   :  { %3011 = shalt.err (!%p3008_p11)
}
  0x59   :  { %54 = dma.hbm_to_vmem [thread:$0]  %s3519_s2, 16, %s52_s29, [#allocation6]  }
  0x5a   :  { %s3012_s25 = scalar_lea.hbm %s3522_s5, 2048 }
  0x5b   :  { %p3013_p12 = scmp.ne.s32.totalorder %s3522_s5, %s3012_s25  ;;  %p3016_p13 = scmp.lt.u32.totalorder %s3012_s25, %s3522_s5 }
  0x5d   :  { %p3018_p0 = pnand %p3016_p13, %p3013_p12 }
  0x5f   :  { %3021 = shalt.err (!%p3018_p0)
}
  0x60   :  { %s3022_s26 = scalar_lea.vmem %s3235_s30, 2048  ;;  %p3027_p2 = scmp.lt.s32.totalorder %s3235_s30, %s3235_s30 }
  0x61   :  { %p3023_p1 = scmp.ne.s32.totalorder %s3235_s30, %s3022_s26  ;;  %p3028_p3 = scmp.lt.s32.totalorder %s3022_s26, %s3022_s26 }
  0x63   :  { %p3029_p4 = por %p3028_p3, %p3027_p2 }
  0x65   :  { %p3030_p5 = pnand %p3029_p4, %p3023_p1 }
  0x67   :  { %3033 = shalt.err (!%p3030_p5)
}
  0x68   :  { %80 = dma.hbm_to_vmem [thread:$0]  %s3522_s5, 2048, %s3235_s30, [#allocation9], %s3096_s9, %s3096_s9, %s3097_s19  }
  0x69   :  { %s3100_s16 = smov [#allocation13]   ;;  %s3034_s0 = scalar_lea.hbm %s3528_s11, 8192 }
  0x6a   :  { %s106_s17 = sshll.u32 %s3100_s16, 4  ;;  %p3035_p6 = scmp.ne.s32.totalorder %s3528_s11, %s3034_s0  ;;  %s107_s17 = int_to_ptr.vmem [resolvable:$true] %s106_s17 }
  0x6b   :  { %p3038_p7 = scmp.lt.u32.totalorder %s3034_s0, %s3528_s11 }
  0x6d   :  { %p3040_p8 = pnand %p3038_p7, %p3035_p6 }
  0x6f   :  { %3043 = shalt.err (!%p3040_p8)
}
  0x70   :  { %s3044_s24 = scalar_lea.vmem %s107_s17, 8192  ;;  %p3049_p10 = scmp.lt.s32.totalorder %s107_s17, %s107_s17 }
  0x71   :  { %p3045_p9 = scmp.ne.s32.totalorder %s107_s17, %s3044_s24  ;;  %p3050_p11 = scmp.lt.s32.totalorder %s3044_s24, %s3044_s24 }
  0x73   :  { %p3051_p12 = por %p3050_p11, %p3049_p10 }
  0x75   :  { %p3052_p13 = pnand %p3051_p12, %p3045_p9 }
  0x77   :  { %3055 = shalt.err (!%p3052_p13)
}
  0x78   :  { %112 = dma.hbm_to_vmem [thread:$0]  %s3528_s11, 8192, %s107_s17, [#allocation12], %s3096_s9, %s3096_s9, %s3097_s19  }
  0x79   :  { %3078 = dma.done.wait [#allocation3], 256  }
  0x7a   :  { %3079 = vsyncadd [#allocation3], 4294967040 }
  0x7b   :  { %3080 = dma.done.wait [#allocation6], 32  }
  0x7c   :  { %3081 = vsyncadd [#allocation6], 4294967264 }
  0x7d   :  { %3082 = dma.done.wait [#allocation9], 8192  }
  0x7e   :  { %3083 = vsyncadd [#allocation9], 4294959104 }
  0x7f   :  { %3084 = dma.done.wait [#allocation12], 16384  }
  0x80   :  { %3085 = vsyncadd [#allocation12], 4294950912  ;;  %v3284_v0 = vld [vmem:[#allocation2] sm:$0xff]  ;;  %v3287_v1 = vld [vmem:[#allocation2 + $0x8] sm:$0xff]  ;;  %vm443_vm0 = vcmask 261120   ;;  %vm531_vm4 = vcmask 130048  }
  0x81   :  { %185 = vadd.xlane.f32.xlu0 %v3284_v0  ;;  %v225_v2 = vld [vmem:[#allocation8 + $0x8] sm:$0xff]  ;;  %v228_v3 = vld [vmem:[#allocation8 + $0x20] sm:$0xff]  ;;  %v227_v6 = vld [vmem:[#allocation8 + $0x18] sm:$0xff]  ;;  %s3104_s27 = smov 64   ;;  %s3105_s29 = smov [#allocation14]  }
  0x82   :  { %v224_v4 = vld [vmem:[#allocation8] sm:$0xff]  ;;  %v2512_v5 = vpack.c.bf16 %v228_v3, %v225_v2  ;;  %v231_v7 = vld [vmem:[#allocation8 + $0x38] sm:$0xff]  ;;  %v234_v8 = vld [vmem:[#allocation8 + $0x50] sm:$0xff]  ;;  %s2166_s16 = sshll.u32 %s3105_s29, 4  ;;  %s2167_s16 = int_to_ptr.vmem [resolvable:$true] %s2166_s16 }
  0x83   :  { %v2514_v9 = vpack.c.bf16 %v227_v6, %v224_v4  ;;  %v2516_v10 = vpack.c.bf16 %v234_v8, %v231_v7  ;;  %v226_v11 = vld [vmem:[#allocation8 + $0x10] sm:$0xff]  ;;  %v229_v12 = vld [vmem:[#allocation8 + $0x28] sm:$0xff]  ;;  %v240_v17 = vld [vmem:[#allocation8 + $0x80] sm:$0xff]  ;;  %v3101_v6 = vmov 0.0   ;;  %p3061_p1 = scmp.lt.s32.totalorder %s2167_s16, %s2167_s16 }
  0x84   :  { %v230_v13 = vld [vmem:[#allocation8 + $0x30] sm:$0xff]  ;;  %2513 = vmatprep.subr.bf16.mxu0 %v2512_v5  ;;  %v2544_v14 = vpack.c.bf16 %v229_v12, %v226_v11  ;;  %v233_v15 = vld [vmem:[#allocation8 + $0x48] sm:$0xff]  ;;  %v232_v19 = vld [vmem:[#allocation8 + $0x40] sm:$0xff]  ;;  %353 = vmatprep.mubr.f32.mxu0 %v3101_v6 }
  0x85   :  { %187 = vadd.xlane.f32.xlu0 %v3287_v1  ;;  %v237_v16 = vld [vmem:[#allocation8 + $0x68] sm:$0xff]  ;;  %2515 = vmatpush1.bf16.msra.mxu0 %v2514_v9  ;;  %v2518_v18 = vpack.c.bf16 %v233_v15, %v230_v13  ;;  %v235_v20 = vld [vmem:[#allocation8 + $0x58] sm:$0xff]  ;;  %v236_v23 = vld [vmem:[#allocation8 + $0x60] sm:$0xff] }
  0x86   :  { %2517 = vmatprep.subr.bf16.mxu0 %v2516_v10  ;;  %2545 = vmatprep.subr.bf16.mxu1 %v2544_v14  ;;  %v2520_v21 = vpack.c.bf16 %v240_v17, %v237_v16  ;;  %v2548_v22 = vpack.c.bf16 %v235_v20, %v232_v19  ;;  %v239_v24 = vld [vmem:[#allocation8 + $0x78] sm:$0xff]  ;;  %v246_v35 = vld [vmem:[#allocation8 + $0xb0] sm:$0xff]  ;;  %v241_v38 = vld [vmem:[#allocation8 + $0x88] sm:$0xff] }
  0x87   :  { %2547 = vmatpush3.bf16.msra.mxu1 %v2544_v14  ;;  %v2522_v25 = vpack.c.bf16 %v239_v24, %v236_v23  ;;  %v243_v34 = vld [vmem:[#allocation8 + $0x98] sm:$0xff]  ;;  %v238_v36 = vld [vmem:[#allocation8 + $0x70] sm:$0xff]  ;;  %v245_v40 = vld [vmem:[#allocation8 + $0xa8] sm:$0xff] }
  0x88   :  { %2549 = vmatprep.subr.bf16.mxu1 %v2548_v22  ;;  %v2524_v37 = vpack.c.bf16 %v246_v35, %v243_v34  ;;  %v242_v39 = vld [vmem:[#allocation8 + $0x90] sm:$0xff]  ;;  %v2552_v41 = vpack.c.bf16 %v241_v38, %v238_v36  ;;  %v249_v43 = vld [vmem:[#allocation8 + $0xc8] sm:$0xff]  ;;  %v252_v44 = vld [vmem:[#allocation8 + $0xe0] sm:$0xff] }
  0x89   :  { %2519 = vmatpush1.bf16.msra.mxu0 %v2518_v18  ;;  %v2526_v42 = vpack.c.bf16 %v245_v40, %v242_v39  ;;  %v244_v45 = vld [vmem:[#allocation8 + $0xa0] sm:$0xff]  ;;  %v2528_v46 = vpack.c.bf16 %v252_v44, %v249_v43  ;;  %v247_v47 = vld [vmem:[#allocation8 + $0xb8] sm:$0xff]  ;;  %v258_v53 = vld [vmem:[#allocation8 + $0x110] sm:$0xff]  ;;  %v138_v39 = vlaneseq }
  0x8a   :  { %2521 = vmatprep.subr.bf16.mxu0 %v2520_v21  ;;  %v248_v48 = vld [vmem:[#allocation8 + $0xc0] sm:$0xff]  ;;  %v251_v49 = vld [vmem:[#allocation8 + $0xd8] sm:$0xff]  ;;  %v2556_v50 = vpack.c.bf16 %v247_v47, %v244_v45  ;;  %v250_v54 = vld [vmem:[#allocation8 + $0xd0] sm:$0xff] }
  0x8b   :  { %2551 = vmatpush3.bf16.msra.mxu1 %v2548_v22  ;;  %v2530_v51 = vpack.c.bf16 %v251_v49, %v248_v48  ;;  %v255_v52 = vld [vmem:[#allocation8 + $0xf8] sm:$0xff]  ;;  %v253_v56 = vld [vmem:[#allocation8 + $0xe8] sm:$0xff]  ;;  %v254_v57 = vld [vmem:[#allocation8 + $0xf0] sm:$0xff]  ;;  %v3304_v40 = vshrl.u32 %v138_v39, 7 }
  0x8c   :  { %2553 = vmatprep.subr.bf16.mxu1 %v2552_v41  ;;  %v2532_v55 = vpack.c.bf16 %v258_v53, %v255_v52  ;;  %v257_v58 = vld [vmem:[#allocation8 + $0x108] sm:$0xff]  ;;  %v2560_v59 = vpack.c.bf16 %v253_v56, %v250_v54  ;;  %v264_v62 = vld [vmem:[#allocation8 + $0x140] sm:$0xff]  ;;  %v259_v3 = vld [vmem:[#allocation8 + $0x118] sm:$0xff] }
  0x8d   :  { %2523 = vmatpush1.bf16.msra.mxu0 %v2522_v25  ;;  %v2534_v60 = vpack.c.bf16 %v257_v58, %v254_v57  ;;  %v261_v61 = vld [vmem:[#allocation8 + $0x128] sm:$0xff]  ;;  %v256_v63 = vld [vmem:[#allocation8 + $0x100] sm:$0xff]  ;;  %v263_v5 = vld [vmem:[#allocation8 + $0x138] sm:$0xff]  ;;  %v280_v43 = vsub.s32 1, %v3304_v40 }
  0x8e   :  { %2525 = vmatprep.subr.bf16.mxu0 %v2524_v37  ;;  %v2536_v2 = vpack.c.bf16 %v264_v62, %v261_v61  ;;  %v260_v4 = vld [vmem:[#allocation8 + $0x120] sm:$0xff]  ;;  %v2564_v7 = vpack.c.bf16 %v259_v3, %v256_v63  ;;  %v267_v9 = vld [vmem:[#allocation8 + $0x158] sm:$0xff]  ;;  %v270_v10 = vld [vmem:[#allocation8 + $0x170] sm:$0xff]  ;;  %v140_v3 = vadd.s32 8, %v3304_v40 }
  0x8f   :  { %2555 = vmatpush3.bf16.msra.mxu1 %v2552_v41  ;;  %v2538_v8 = vpack.c.bf16 %v263_v5, %v260_v4  ;;  %v262_v11 = vld [vmem:[#allocation8 + $0x130] sm:$0xff]  ;;  %v2540_v12 = vpack.c.bf16 %v270_v10, %v267_v9  ;;  %v265_v13 = vld [vmem:[#allocation8 + $0x148] sm:$0xff]  ;;  %v268_v18 = vld [vmem:[#allocation8 + $0x160] sm:$0xff]  ;;  %v276_v41 = vsub.s32 0, %v3304_v40  ;;  %v166_v4 = vand.u32 127, %v138_v39 }
  0x90   :  { %2557 = vmatprep.subr.bf16.mxu1 %v2556_v50  ;;  %v266_v14 = vld [vmem:[#allocation8 + $0x150] sm:$0xff]  ;;  %v269_v15 = vld [vmem:[#allocation8 + $0x168] sm:$0xff]  ;;  %v2568_v16 = vpack.c.bf16 %v265_v13, %v262_v11  ;;  %v271_v19 = vld [vmem:[#allocation8 + $0x178] sm:$0xff]  ;;  %v152_v5 = vand.u32 1, %v140_v3  ;;  %v3102_v9 = vmov -1e+30  }
  0x91   :  { %2527 = vmatpush1.bf16.msra.mxu0 %v2526_v42  ;;  %v2542_v17 = vpack.c.bf16 %v269_v15, %v266_v14  ;;  %v2572_v20 = vpack.c.bf16 %v271_v19, %v268_v18  ;;  %v284_v42 = vsub.s32 2, %v3304_v40  ;;  %vm3324_vm1 = vmpackc.low %vm443_vm0, %vm443_vm0 }
  0x92   :  { %2529 = vmatprep.subr.bf16.mxu0 %v2528_v46 }
  0x93   :  { %2559 = vmatpush3.bf16.msra.mxu1 %v2556_v50 }
  0x94   :  { %2561 = vmatprep.subr.bf16.mxu1 %v2560_v59 }
  0x95   :  { %2531 = vmatpush1.bf16.msra.mxu0 %v2530_v51 }
  0x96   :  { %2533 = vmatprep.subr.bf16.mxu0 %v2532_v55 }
  0x97   :  { %2563 = vmatpush3.bf16.msra.mxu1 %v2560_v59 }
  0x98   :  { %2565 = vmatprep.subr.bf16.mxu1 %v2564_v7 }
  0x99   :  { %2535 = vmatpush1.bf16.msra.mxu0 %v2534_v60 }
  0x9a   :  { %2537 = vmatprep.subr.bf16.mxu0 %v2536_v2 }
  0x9b   :  { %2567 = vmatpush3.bf16.msra.mxu1 %v2564_v7  ;;  %v171_v7 = vand.u32 1, %v166_v4 }
  0x9c   :  { %2569 = vmatprep.subr.bf16.mxu1 %v2568_v16 }
  0x9d   :  { %2539 = vmatpush1.bf16.msra.mxu0 %v2538_v8  ;;  %v145_v8 = vand.u32 1, %v3304_v40  ;;  %vm180_vm2 = vcmp.eq.s32.totalorder %v152_v5, %v171_v7 }
  0x9e   :  { %2541 = vmatprep.subr.bf16.mxu0 %v2540_v12  ;;  %v3342_v10 = vsel %vm180_vm2, 0.0, %v3102_v9 }
  0x9f   :  { %2571 = vmatpush3.bf16.msra.mxu1 %v2568_v16  ;;  %vm179_vm3 = vcmp.eq.s32.totalorder %v145_v8, %v171_v7 }
  0xa0   :  { %2573 = vmatprep.subr.bf16.mxu1 %v2572_v20  ;;  %v3344_v11 = vsel %vm179_vm3, 0.0, %v3102_v9 }
  0xa1   :  { %2543 = vmatpush1.bf16.msra.mxu0 %v2542_v17 }
  0xa3   :  { %2575 = vmatpush3.bf16.msra.mxu1 %v2572_v20 }
 0x10e   :  { %v186_v26 = vpop.xlane.xlu0 %185 }
 0x10f   :  { %v190_v27 = vmul.f32 0.0078125, %v186_v26 }
 0x111   :  { %v3291_v28 = vsub.f32 %v3284_v0, %v190_v27 }
 0x112   :  { %v188_v29 = vpop.xlane.xlu0 %187 }
 0x113   :  { %v191_v30 = vmul.f32 0.0078125, %v188_v29  ;;  %v194_v31 = vmul.f32 %v3291_v28, %v3291_v28  ;;  %v2181_v29 = vld [vmem:[#allocation5] ss:$0 sm:$0xff] }
 0x115   :  { %v3296_v32 = vsub.f32 %v3287_v1, %v191_v30  ;;  %196 = vadd.xlane.f32.xlu1 %v194_v31  ;;  %v2182_v31 = vld [vmem:[#allocation7] ss:$0 sm:$0xff] }
 0x117   :  { %v195_v33 = vmul.f32 %v3296_v32, %v3296_v32 }
 0x119   :  { %198 = vadd.xlane.f32.xlu1 %v195_v33 }
 0x1a2   :  { %v197_v21 = vpop.xlane.xlu1 %196 }
 0x1a3   :  { %v200_v22 = vmul.f32 0.0078125, %v197_v21 }
 0x1a5   :  { %v202_v23 = vadd.f32 1e-05, %v200_v22 }
 0x1a6   :  { %v199_v24 = vpop.xlane.xlu1 %198 }
 0x1a7   :  { %2830 = vrsqrt.f32 %v202_v23  ;;  %v201_v25 = vmul.f32 0.0078125, %v199_v24 }
 0x1a9   :  { %v203_v26 = vadd.f32 1e-05, %v201_v25 }
 0x1ab   :  { %2832 = vrsqrt.f32 %v203_v26 }
 0x1b1   :  { %v2831_v27 = vpop.eup %2830 }
 0x1b2   :  { %v206_v30 = vmul.f32 %v2831_v27, %v3291_v28  ;;  %v272_v28 = vld [vmem:[%s3521_s4] sm:$0x7]  ;;  %s3103_s4 = smov 96  }
 0x1b3   :  { %v285_v47 = vrot.slane %v272_v28, %v284_v42  ;;  %v281_v48 = vrot.slane %v272_v28, %v280_v43 }
 0x1b4   :  { %v214_v33 = vmul.f32 %v2181_v29, %v206_v30 }
 0x1b5   :  { %v2833_v34 = vpop.eup %2832 }
 0x1b6   :  { %v222_v35 = vadd.f32 %v2182_v31, %v214_v33  ;;  %v207_v36 = vmul.f32 %v2833_v34, %v3296_v32  ;;  %v277_v32 = vrot.slane %v272_v28, %v276_v41 }
 0x1b8   :  { %354 = vmatmul.mubr.f32.vlgmr.msra.gmra.mrb[0].mxu0 %v222_v35  ;;  %2409 = vmatprep.mubr.f32.mxu1 %v222_v35  ;;  %v215_v37 = vmul.f32 %v2181_v29, %v207_v36 }
 0x1b9   :  { %359 = vmatprep.mubr.f32.mxu0 %v3101_v6 }
 0x1ba   :  { %v223_v38 = vadd.f32 %v2182_v31, %v215_v37 }
 0x1bc   :  { %360 = vmatmul.mubr.f32.gmra.mrb[2].mxu0 %v223_v38  ;;  %2410 = vmatmul.mubr.f32.vlgmr.msra.gmra.mrb[0].mxu1 %v223_v38 }
 0x28b   :  { %v355_v44 = vpop.f32.mrb[0].mxu0 }
 0x28c   :  { %v356_v45 = vadd.f32 %v355_v44, %v277_v32  ;;  %v357_v46 = vpop.f32.mrb[1].mxu0 }
 0x28d   :  { %v358_v55 = vadd.f32 %v357_v46, %v281_v48 }
 0x28e   :  { %v3318_v49 = vmul.f32 0.17677669, %v356_v45 }
 0x28f   :  { %v361_v50 = vpop.f32.mrb[2].mxu0  ;;  %v2411_v51 = vpop.f32.mrb[0].mxu1 }
 0x290   :  { %v438_v52 = vadd.f32 %v2411_v51, %v285_v47  ;;  %v363_v53 = vpop.f32.mrb[3].mxu0  ;;  %v432_v54 = vpop.f32.mrb[1].mxu1  ;;  %2416 = vmatprep.mubr.msk.f32.mxu0 %vm443_vm0, %v3318_v49  ;;  %v362_v63 = vadd.f32 %v361_v50, %v277_v32 }
 0x291   :  { %v364_v56 = vadd.f32 %v363_v53, %v281_v48  ;;  %v433_v57 = vadd.f32 %v432_v54, %v285_v47 }
 0x292   :  { %v3336_v2 = vmul.f32 0.17677669, %v362_v63 }
 0x293   :  { %v2576_v59 = vpack.c.bf16 %v364_v56, %v358_v55  ;;  %v2582_v60 = vpack.c.bf16 %v438_v52, %v433_v57  ;;  %v3328_v61 = vpack.i.bf16 %v364_v56, %v358_v55  ;;  %v3330_v62 = vpack.i.bf16 %v438_v52, %v433_v57 }
 0x295   :  { %2578 = vmatprep.subr.msk.bf16.mxu0 %vm3324_vm1, %v2576_v59  ;;  %2583 = vmatprep.subr.bf16.mxu1 %v2582_v60 }
 0x296   :  { %2581 = vmatpush3.bf16.xpose.msk.msra.mxu0 %vm3324_vm1, %v2576_v59  ;;  %2585 = vmatpush3.bf16.msra.mxu1 %v2582_v60 }
 0x29d   :  { %2417 = vmatmul.mubr.msk.f32.vlgmr.msra.gmra.mrb[4].mxu0 %vm443_vm0, %v3336_v2 }
 0x370   :  { %v2418_v12 = vpop.f32.mrb[4].mxu0 }
 0x371   :  { %v528_v13 = vadd.f32 %v2418_v12, %v3342_v10  ;;  %v522_v14 = vpop.f32.mrb[5].mxu0  ;;  %v841_v12 = vld [vmem:[#allocation10 + $0x20] sm:$0xff] }
 0x372   :  { %v523_v15 = vadd.f32 %v522_v14, %v3344_v11  ;;  %v843_v14 = vld [vmem:[#allocation10 + $0x30] sm:$0xff] }
 0x373   :  { %v535_v16 = vsel %vm531_vm4, %v528_v13, -inf }
 0x374   :  { %536 = vmax.xlane.f32.xlu1 %v535_v16  ;;  %v532_v17 = vsel %vm531_vm4, %v523_v15, -inf  ;;  %v844_v16 = vld [vmem:[#allocation10 + $0x38] sm:$0xff] }
 0x375   :  { %533 = vmax.xlane.f32.xlu0 %v532_v17  ;;  %v2600_v17 = vpack.c.bf16 %v844_v16, %v843_v14 }
 0x401   :  { %v537_v18 = vpop.xlane.xlu1 %536 }
 0x402   :  { %v539_v19 = vsub.f32 %v528_v13, %v537_v18  ;;  %v534_v20 = vpop.xlane.xlu0 %533  ;;  %v842_v13 = vld [vmem:[#allocation10 + $0x28] sm:$0xff] }
 0x403   :  { %v538_v21 = vsub.f32 %v523_v15, %v534_v20  ;;  %v2596_v15 = vpack.c.bf16 %v842_v13, %v841_v12 }
 0x404   :  { %v542_v22 = vmul.f32 1.442695, %v539_v19 }
 0x405   :  { %v540_v23 = vmul.f32 1.442695, %v538_v21  ;;  %2597 = vmatprep.subr.bf16.mxu0 %v2596_v15 }
 0x406   :  { %2834 = vpow2.f32 %v542_v22  ;;  %2599 = vmatpush3.bf16.msra.mxu0 %v2596_v15 }
 0x407   :  { %2836 = vpow2.f32 %v540_v23  ;;  %2601 = vmatprep.subr.bf16.mxu0 %v2600_v17 }
 0x40a   :  { %2603 = vmatpush3.bf16.msra.mxu0 %v2600_v17 }
 0x410   :  { %v2835_v24 = vpop.eup %2834 }
 0x411   :  { %v2837_v25 = vpop.eup %2836  ;;  %v547_v26 = vsel %vm531_vm4, %v2835_v24, 0.0 }
 0x412   :  { %548 = vadd.xlane.f32.xlu1 %v547_v26  ;;  %v544_v27 = vsel %vm531_vm4, %v2837_v25, 0.0 }
 0x413   :  { %545 = vadd.xlane.f32.xlu0 %v544_v27 }
 0x423   :  { %639 = vrot.lane.b32.xlu1 %v3318_v49, %s3103_s4 }
 0x427   :  { %641 = vrot.lane.b32.xlu1 %v3336_v2, %s3103_s4 }
 0x429   :  { %2801 = vrot.lane.b32.xlu0 %v3328_v61, %s3103_s4 }
 0x49f   :  { %v549_v29 = vpop.xlane.xlu1 %548 }
 0x4a0   :  { %2838 = vrcp.f32 %v549_v29  ;;  %v546_v30 = vpop.xlane.xlu0 %545 }
 0x4a1   :  { %2840 = vrcp.f32 %v546_v30 }
 0x4a3   :  { %v640_v28 = vpop.permute.xlu1 %639 }
 0x4a4   :  { %v2802_v31 = vpop.permute.xlu0 %2801 }
 0x4a5   :  { %v2804_v33 = vunpack.i.h.bf16 %v2802_v31  ;;  %v2803_v34 = vunpack.i.l.bf16 %v2802_v31  ;;  %v635_v31 = vld [vmem:[#allocation10] sm:$0xff] }
 0x4a7   :  { %v2586_v35 = vpack.c.bf16 %v2804_v33, %v2803_v34  ;;  %v642_v32 = vpop.permute.xlu1 %641  ;;  %v636_v33 = vld [vmem:[#allocation10 + $0x8] sm:$0xff] }
 0x4a8   :  { %v2604_v34 = vpack.c.bf16 %v636_v33, %v635_v31 }
 0x4a9   :  { %2588 = vmatprep.subr.msk.bf16.mxu1 %vm3324_vm1, %v2586_v35 }
 0x4aa   :  { %v2839_v36 = vpop.eup %2838  ;;  %2605 = vmatprep.subr.bf16.mxu0 %v2604_v34 }
 0x4ab   :  { %v2841_v37 = vpop.eup %2840  ;;  %v553_v39 = vmul.f32 %v2839_v36, %v2835_v24  ;;  %v638_v36 = vld [vmem:[#allocation10 + $0x18] sm:$0xff] }
 0x4ac   :  { %v551_v38 = vmul.f32 %v2841_v37, %v2837_v25 }
 0x4ae   :  { %2423 = vmatprep.mubr.msk.f32.mxu1 %vm531_vm4, %v551_v38 }
 0x4af   :  { %2424 = vmatmul.mubr.msk.f32.vlgmr.msra.gmra.mrb[2].mxu1 %vm531_vm4, %v553_v39 }
 0x4b0   :  { %2591 = vmatpush3.bf16.xpose.msk.msra.mxu1 %vm3324_vm1, %v2586_v35  ;;  %2430 = vmatprep.mubr.msk.f32.mxu1 %vm443_vm0, %v640_v28  ;;  %v637_v35 = vld [vmem:[#allocation10 + $0x10] sm:$0xff] }
 0x4b1   :  { %v2608_v39 = vpack.c.bf16 %v638_v36, %v637_v35 }
 0x4b7   :  { %2431 = vmatmul.mubr.msk.f32.vlgmr.msra.gmra.mrb[4].mxu1 %vm443_vm0, %v642_v32 }
 0x582   :  { %v3366_v44 = vpop.f32.mrb[2].mxu1 }
 0x583   :  { %v3368_v45 = vpop.f32.mrb[3].mxu1 }
 0x58a   :  { %v2432_v46 = vpop.f32.mrb[4].mxu1 }
 0x58b   :  { %v727_v47 = vadd.f32 %v2432_v46, %v3342_v10  ;;  %v721_v48 = vpop.f32.mrb[5].mxu1 }
 0x58c   :  { %v722_v50 = vadd.f32 %v721_v48, %v3344_v11 }
 0x58d   :  { %v733_v51 = vsel %vm531_vm4, %v727_v47, -inf }
 0x58e   :  { %734 = vmax.xlane.f32.xlu0 %v733_v51  ;;  %v730_v52 = vsel %vm531_vm4, %v722_v50, -inf }
 0x58f   :  { %731 = vmax.xlane.f32.xlu1 %v730_v52 }
 0x5a0   :  { %2806 = vrot.lane.b32.xlu1 %v3330_v62, %s3103_s4 }
 0x5a4   :  { %1007 = vrot.lane.b32.xlu1 %v3318_v49, %s3104_s27 }
 0x5a8   :  { %1009 = vrot.lane.b32.xlu1 %v3336_v2, %s3104_s27 }
 0x61b   :  { %v735_v53 = vpop.xlane.xlu0 %734 }
 0x61c   :  { %v737_v54 = vsub.f32 %v727_v47, %v735_v53  ;;  %v732_v55 = vpop.xlane.xlu1 %731 }
 0x61d   :  { %v736_v56 = vsub.f32 %v722_v50, %v732_v55 }
 0x61e   :  { %v740_v57 = vmul.f32 1.442695, %v737_v54 }
 0x61f   :  { %v738_v59 = vmul.f32 1.442695, %v736_v56 }
 0x620   :  { %2842 = vpow2.f32 %v740_v57  ;;  %v2807_v60 = vpop.permute.xlu1 %2806 }
 0x621   :  { %v2809_v63 = vunpack.i.h.bf16 %v2807_v60  ;;  %v2808_v3 = vunpack.i.l.bf16 %v2807_v60  ;;  %2844 = vpow2.f32 %v738_v59 }
 0x623   :  { %v2592_v4 = vpack.c.bf16 %v2809_v63, %v2808_v3  ;;  %v1207_v3 = vld [vmem:[#allocation10 + $0x40] sm:$0xff] }
 0x624   :  { %v1008_v29 = vpop.permute.xlu1 %1007 }
 0x625   :  { %2593 = vmatprep.subr.bf16.mxu1 %v2592_v4 }
 0x626   :  { %2595 = vmatpush3.bf16.msra.mxu1 %v2592_v4  ;;  %v1208_v4 = vld [vmem:[#allocation10 + $0x48] sm:$0xff] }
 0x628   :  { %v1010_v30 = vpop.permute.xlu1 %1009 }
 0x62a   :  { %v2843_v5 = vpop.eup %2842 }
 0x62b   :  { %v745_v7 = vsel %vm531_vm4, %v2843_v5, 0.0  ;;  %v2845_v8 = vpop.eup %2844 }
 0x62c   :  { %746 = vadd.xlane.f32.xlu0 %v745_v7  ;;  %v742_v9 = vsel %vm531_vm4, %v2845_v8, 0.0  ;;  %v2622_v7 = vpack.c.bf16 %v1208_v4, %v1207_v3 }
 0x630   :  { %743 = vadd.xlane.f32.xlu0 %v742_v9 }
 0x646   :  { %2811 = vrot.lane.b32.xlu0 %v3328_v61, %s3104_s27 }
 0x6b9   :  { %v747_v18 = vpop.xlane.xlu0 %746 }
 0x6ba   :  { %2846 = vrcp.f32 %v747_v18 }
 0x6bd   :  { %v744_v19 = vpop.xlane.xlu0 %743 }
 0x6be   :  { %2848 = vrcp.f32 %v744_v19 }
 0x6c1   :  { %v2812_v20 = vpop.permute.xlu0 %2811 }
 0x6c2   :  { %v2814_v21 = vunpack.i.h.bf16 %v2812_v20  ;;  %v2813_v22 = vunpack.i.l.bf16 %v2812_v20 }
 0x6c4   :  { %v2612_v23 = vpack.c.bf16 %v2814_v21, %v2813_v22  ;;  %v2847_v24 = vpop.eup %2846 }
 0x6c5   :  { %v751_v27 = vmul.f32 %v2847_v24, %v2843_v5  ;;  %v1209_v5 = vld [vmem:[#allocation10 + $0x50] sm:$0xff] }
 0x6c6   :  { %2614 = vmatprep.subr.msk.bf16.mxu1 %vm3324_vm1, %v2612_v23 }
 0x6c8   :  { %v2849_v25 = vpop.eup %2848 }
 0x6c9   :  { %v749_v26 = vmul.f32 %v2849_v25, %v2845_v8  ;;  %v1210_v8 = vld [vmem:[#allocation10 + $0x58] sm:$0xff] }
 0x6ca   :  { %v2626_v9 = vpack.c.bf16 %v1210_v8, %v1209_v5  ;;  %v1633_v8 = vld [vmem:[#allocation11 + $0x8] sm:$0xff] }
 0x6cb   :  { %2437 = vmatprep.mubr.msk.f32.mxu1 %vm531_vm4, %v749_v26 }
 0x6cc   :  { %2438 = vmatmul.mubr.msk.f32.vlgmr.msra.gmra.mrb[6].mxu1 %vm531_vm4, %v751_v27 }
 0x6cd   :  { %2617 = vmatpush3.bf16.xpose.msk.msra.mxu1 %vm3324_vm1, %v2612_v23  ;;  %2466 = vmatprep.mubr.msk.f32.mxu1 %vm443_vm0, %v1008_v29 }
 0x6d4   :  { %2467 = vmatmul.mubr.msk.f32.vlgmr.msra.gmra.mrb[8].mxu1 %vm443_vm0, %v1010_v30 }
 0x79f   :  { %v2439_v37 = vpop.f32.mrb[6].mxu1 }
 0x7a0   :  { %v832_v38 = vpop.f32.mrb[7].mxu1 }
 0x7a1   :  { %2448 = vmatprep.mubr.msk.f32.mxu0 %vm443_vm0, %v832_v38 }
 0x7a2   :  { %2449 = vmatmul.mubr.msk.f32.vlgmr.msra.gmra.mrb[6].mxu0 %vm443_vm0, %v2439_v37 }
 0x7a3   :  { %2607 = vmatpush3.bf16.msra.mxu0 %v2604_v34  ;;  %2459 = vmatprep.mubr.msk.f32.mxu0 %vm443_vm0, %v3368_v45 }
 0x7a4   :  { %2609 = vmatprep.subr.bf16.mxu0 %v2608_v39 }
 0x7a7   :  { %v2468_v28 = vpop.f32.mrb[8].mxu1  ;;  %2611 = vmatpush3.bf16.msra.mxu0 %v2608_v39 }
 0x7a8   :  { %v1095_v32 = vadd.f32 %v2468_v28, %v3342_v10  ;;  %v1089_v46 = vpop.f32.mrb[9].mxu1  ;;  %2623 = vmatprep.subr.bf16.mxu0 %v2622_v7 }
 0x7a9   :  { %v1090_v47 = vadd.f32 %v1089_v46, %v3344_v11 }
 0x7aa   :  { %v1101_v48 = vsel %vm531_vm4, %v1095_v32, -inf  ;;  %2460 = vmatmul.mubr.msk.f32.vlgmr.msra.gmra.mrb[6].mxu0 %vm443_vm0, %v3366_v44 }
 0x7ab   :  { %1102 = vmax.xlane.f32.xlu0 %v1101_v48  ;;  %v1098_v50 = vsel %vm531_vm4, %v1090_v47, -inf  ;;  %2625 = vmatpush3.bf16.msra.mxu0 %v2622_v7  ;;  %v1495_v48 = vld [vmem:[#allocation10 + $0x68] sm:$0xff] }
 0x7ac   :  { %1099 = vmax.xlane.f32.xlu1 %v1098_v50  ;;  %2627 = vmatprep.subr.bf16.mxu0 %v2626_v9  ;;  %v1496_v50 = vld [vmem:[#allocation10 + $0x70] sm:$0xff] }
 0x7af   :  { %2629 = vmatpush3.bf16.msra.mxu0 %v2626_v9  ;;  %v1637_v9 = vld [vmem:[#allocation11 + $0x28] sm:$0xff] }
 0x7bd   :  { %2816 = vrot.lane.b32.xlu1 %v3330_v62, %s3104_s27 }
 0x7c1   :  { %1294 = vrot.lane.b32.xlu1 %v3318_v49, %s3094_s28 }
 0x7c5   :  { %1296 = vrot.lane.b32.xlu1 %v3336_v2, %s3094_s28 }
 0x838   :  { %v1103_v45 = vpop.xlane.xlu0 %1102 }
 0x839   :  { %v1105_v51 = vsub.f32 %v1095_v32, %v1103_v45  ;;  %v1100_v52 = vpop.xlane.xlu1 %1099 }
 0x83a   :  { %v1104_v53 = vsub.f32 %v1090_v47, %v1100_v52  ;;  %v1494_v47 = vld [vmem:[#allocation10 + $0x60] sm:$0xff] }
 0x83b   :  { %v1108_v54 = vmul.f32 1.442695, %v1105_v51  ;;  %v2640_v45 = vpack.c.bf16 %v1495_v48, %v1494_v47  ;;  %v1497_v51 = vld [vmem:[#allocation10 + $0x78] sm:$0xff] }
 0x83c   :  { %v1106_v55 = vmul.f32 1.442695, %v1104_v53  ;;  %v2644_v52 = vpack.c.bf16 %v1497_v51, %v1496_v50 }
 0x83d   :  { %2850 = vpow2.f32 %v1108_v54  ;;  %v2817_v44 = vpop.permute.xlu1 %2816  ;;  %2641 = vmatprep.subr.bf16.mxu0 %v2640_v45 }
 0x83e   :  { %v2819_v56 = vunpack.i.h.bf16 %v2817_v44  ;;  %v2818_v57 = vunpack.i.l.bf16 %v2817_v44  ;;  %2852 = vpow2.f32 %v1106_v55 }
 0x840   :  { %v2618_v59 = vpack.c.bf16 %v2819_v56, %v2818_v57 }
 0x841   :  { %v1295_v21 = vpop.permute.xlu1 %1294 }
 0x842   :  { %2619 = vmatprep.subr.bf16.mxu1 %v2618_v59 }
 0x843   :  { %2621 = vmatpush3.bf16.msra.mxu1 %v2618_v59 }
 0x845   :  { %v1297_v22 = vpop.permute.xlu1 %1296 }
 0x847   :  { %v2851_v60 = vpop.eup %2850 }
 0x848   :  { %v1113_v49 = vsel %vm531_vm4, %v2851_v60, 0.0  ;;  %v2853_v63 = vpop.eup %2852 }
 0x849   :  { %1114 = vadd.xlane.f32.xlu0 %v1113_v49  ;;  %v1110_v2 = vsel %vm531_vm4, %v2853_v63, 0.0 }
 0x84d   :  { %1111 = vadd.xlane.f32.xlu0 %v1110_v2 }
 0x863   :  { %2821 = vrot.lane.b32.xlu0 %v3328_v61, %s3094_s28 }
 0x8d6   :  { %v1115_v12 = vpop.xlane.xlu0 %1114 }
 0x8d7   :  { %2854 = vrcp.f32 %v1115_v12  ;;  %v1635_v12 = vld [vmem:[#allocation11 + $0x18] sm:$0xff] }
 0x8da   :  { %v1112_v13 = vpop.xlane.xlu0 %1111 }
 0x8db   :  { %2856 = vrcp.f32 %v1112_v13  ;;  %v2648_v13 = vpack.c.bf16 %v1637_v9, %v1633_v8  ;;  %v1669_v8 = vld [vmem:[#allocation11 + $0x128] sm:$0xff]  ;;  %v1667_v9 = vld [vmem:[#allocation11 + $0x118] sm:$0xff] }
 0x8de   :  { %v2822_v14 = vpop.permute.xlu0 %2821 }
 0x8df   :  { %v2824_v15 = vunpack.i.h.bf16 %v2822_v14  ;;  %v2823_v16 = vunpack.i.l.bf16 %v2822_v14  ;;  %v1639_v14 = vld [vmem:[#allocation11 + $0x38] sm:$0xff] }
 0x8e1   :  { %v2630_v17 = vpack.c.bf16 %v2824_v15, %v2823_v16  ;;  %v2855_v61 = vpop.eup %2854  ;;  %v1632_v15 = vld [vmem:[#allocation11] sm:$0xff] }
 0x8e2   :  { %v1119_v20 = vmul.f32 %v2855_v61, %v2851_v60  ;;  %v1636_v16 = vld [vmem:[#allocation11 + $0x20] sm:$0xff] }
 0x8e3   :  { %2632 = vmatprep.subr.msk.bf16.mxu1 %vm3324_vm1, %v2630_v17  ;;  %v2650_v61 = vpack.c.bf16 %v1636_v16, %v1632_v15  ;;  %v1668_v15 = vld [vmem:[#allocation11 + $0x120] sm:$0xff] }
 0x8e5   :  { %v2857_v18 = vpop.eup %2856 }
 0x8e6   :  { %v1117_v19 = vmul.f32 %v2857_v18, %v2853_v63  ;;  %v2215_v63 = vld [vmem:[%s3523_s6] ss:$0 sm:$0xff]  ;;  %v1638_v18 = vld [vmem:[#allocation11 + $0x30] sm:$0xff] }
 0x8e8   :  { %2473 = vmatprep.mubr.msk.f32.mxu1 %vm531_vm4, %v1117_v19 }
 0x8e9   :  { %2474 = vmatmul.mubr.msk.f32.vlgmr.msra.gmra.mrb[10].mxu1 %vm531_vm4, %v1119_v20  ;;  %v1645_v20 = vld [vmem:[#allocation11 + $0x68] sm:$0xff] }
 0x8ea   :  { %2635 = vmatpush3.bf16.xpose.msk.msra.mxu1 %vm3324_vm1, %v2630_v17  ;;  %2491 = vmatprep.mubr.msk.f32.mxu1 %vm443_vm0, %v1295_v21  ;;  %v2680_v17 = vpack.c.bf16 %v1639_v14, %v1635_v12  ;;  %v1643_v21 = vld [vmem:[#allocation11 + $0x58] sm:$0xff]  ;;  %v1664_v14 = vld [vmem:[#allocation11 + $0x100] sm:$0xff] }
 0x8f1   :  { %2492 = vmatmul.mubr.msk.f32.vlgmr.msra.gmra.mrb[12].mxu1 %vm443_vm0, %v1297_v22  ;;  %v1647_v22 = vld [vmem:[#allocation11 + $0x78] sm:$0xff] }
 0x9bc   :  { %v2475_v23 = vpop.f32.mrb[10].mxu1 }
 0x9bd   :  { %v1198_v24 = vpop.f32.mrb[11].mxu1 }
 0x9be   :  { %2484 = vmatprep.mubr.msk.f32.mxu0 %vm443_vm0, %v1198_v24  ;;  %v2684_v24 = vpack.c.bf16 %v1647_v22, %v1643_v21  ;;  %v1679_v22 = vld [vmem:[#allocation11 + $0x178] sm:$0xff] }
 0x9bf   :  { %2485 = vmatmul.mubr.msk.f32.vlgmr.msra.gmra.mrb[6].mxu0 %vm443_vm0, %v2475_v23 }
 0x9c0   :  { %2643 = vmatpush3.bf16.msra.mxu0 %v2640_v45 }
 0x9c1   :  { %2645 = vmatprep.subr.bf16.mxu0 %v2644_v52 }
 0x9c4   :  { %v2493_v25 = vpop.f32.mrb[12].mxu1  ;;  %2647 = vmatpush3.bf16.msra.mxu0 %v2644_v52 }
 0x9c5   :  { %v1382_v26 = vadd.f32 %v2493_v25, %v3342_v10  ;;  %v1376_v27 = vpop.f32.mrb[13].mxu1  ;;  %2681 = vmatprep.subr.bf16.mxu0 %v2680_v17  ;;  %v1640_v25 = vld [vmem:[#allocation11 + $0x40] sm:$0xff]  ;;  %v2666_v17 = vpack.c.bf16 %v1668_v15, %v1664_v14 }
 0x9c6   :  { %v1377_v29 = vadd.f32 %v1376_v27, %v3344_v11  ;;  %v1642_v27 = vld [vmem:[#allocation11 + $0x50] sm:$0xff] }
 0x9c7   :  { %v1388_v58 = vsel %vm531_vm4, %v1382_v26, -inf }
 0x9c8   :  { %1389 = vmax.xlane.f32.xlu0 %v1388_v58  ;;  %v1385_v30 = vsel %vm531_vm4, %v1377_v29, -inf  ;;  %v1646_v58 = vld [vmem:[#allocation11 + $0x70] sm:$0xff] }
 0x9c9   :  { %1386 = vmax.xlane.f32.xlu1 %v1385_v30  ;;  %v1649_v30 = vld [vmem:[#allocation11 + $0x88] sm:$0xff] }
 0x9da   :  { %2826 = vrot.lane.b32.xlu1 %v3330_v62, %s3094_s28 }
 0xa55   :  { %v1390_v31 = vpop.xlane.xlu0 %1389 }
 0xa56   :  { %v1392_v33 = vsub.f32 %v1382_v26, %v1390_v31  ;;  %v1387_v34 = vpop.xlane.xlu1 %1386  ;;  %v1644_v26 = vld [vmem:[#allocation11 + $0x60] sm:$0xff]  ;;  %v1653_v31 = vld [vmem:[#allocation11 + $0xa8] sm:$0xff] }
 0xa57   :  { %v1391_v35 = vsub.f32 %v1377_v29, %v1387_v34  ;;  %v2654_v29 = vpack.c.bf16 %v1644_v26, %v1640_v25  ;;  %v2656_v34 = vpack.c.bf16 %v1653_v31, %v1649_v30  ;;  %v1685_v31 = vld [vmem:[#allocation11 + $0x1a8] sm:$0xff] }
 0xa58   :  { %v1395_v36 = vmul.f32 1.442695, %v1392_v33  ;;  %v2686_v33 = vpack.c.bf16 %v1646_v58, %v1642_v27  ;;  %v1674_v27 = vld [vmem:[#allocation11 + $0x150] sm:$0xff]  ;;  %v1681_v58 = vld [vmem:[#allocation11 + $0x188] sm:$0xff] }
 0xa59   :  { %v1393_v37 = vmul.f32 1.442695, %v1391_v35  ;;  %v1651_v35 = vld [vmem:[#allocation11 + $0x98] sm:$0xff] }
 0xa5a   :  { %v2827_v38 = vpop.permute.xlu1 %2826 }
 0xa5b   :  { %2858 = vpow2.f32 %v1393_v37  ;;  %v2829_v10 = vunpack.i.h.bf16 %v2827_v38  ;;  %v2828_v39 = vunpack.i.l.bf16 %v2827_v38  ;;  %v1648_v37 = vld [vmem:[#allocation11 + $0x80] sm:$0xff] }
 0xa5c   :  { %2860 = vpow2.f32 %v1395_v36  ;;  %v1655_v36 = vld [vmem:[#allocation11 + $0xb8] sm:$0xff] }
 0xa5d   :  { %v2636_v11 = vpack.c.bf16 %v2829_v10, %v2828_v39  ;;  %v2688_v38 = vpack.c.bf16 %v1655_v36, %v1651_v35  ;;  %v1652_v10 = vld [vmem:[#allocation11 + $0xa0] sm:$0xff]  ;;  %v1650_v39 = vld [vmem:[#allocation11 + $0x90] sm:$0xff]  ;;  %v2672_v35 = vpack.c.bf16 %v1685_v31, %v1681_v58 }
 0xa5e   :  { %v1938_v58 = vld [vmem:[#allocation13 + $0x10] sm:$0xff] }
 0xa5f   :  { %2637 = vmatprep.subr.bf16.mxu1 %v2636_v11 }
 0xa60   :  { %2639 = vmatpush3.bf16.msra.mxu1 %v2636_v11  ;;  %v1654_v11 = vld [vmem:[#allocation11 + $0xb0] sm:$0xff] }
 0xa61   :  { %2649 = vmatprep.subr.bf16.mxu1 %v2648_v13  ;;  %v1671_v13 = vld [vmem:[#allocation11 + $0x138] sm:$0xff] }
 0xa62   :  { %v2696_v16 = vpack.c.bf16 %v1671_v13, %v1667_v9  ;;  %v2217_v9 = vld [vmem:[%s3525_s8] ss:$0 sm:$0xff] }
 0xa65   :  { %v2859_v28 = vpop.eup %2858 }
 0xa66   :  { %v1397_v32 = vsel %vm531_vm4, %v2859_v28, 0.0  ;;  %v2861_v46 = vpop.eup %2860 }
 0xa67   :  { %1398 = vadd.xlane.f32.xlu0 %v1397_v32  ;;  %v1400_v62 = vsel %vm531_vm4, %v2861_v46, 0.0  ;;  %v2690_v32 = vpack.c.bf16 %v1654_v11, %v1650_v39  ;;  %v1686_v11 = vld [vmem:[#allocation11 + $0x1b0] sm:$0xff] }
 0xa6b   :  { %1401 = vadd.xlane.f32.xlu0 %v1400_v62 }
 0xaf4   :  { %v1399_v53 = vpop.xlane.xlu0 %1398 }
 0xaf5   :  { %2862 = vrcp.f32 %v1399_v53  ;;  %v1657_v53 = vld [vmem:[#allocation11 + $0xc8] sm:$0xff] }
 0xaf8   :  { %v1402_v54 = vpop.xlane.xlu0 %1401 }
 0xaf9   :  { %2864 = vrcp.f32 %v1402_v54  ;;  %v1661_v54 = vld [vmem:[#allocation11 + $0xe8] sm:$0xff] }
 0xaff   :  { %v2863_v55 = vpop.eup %2862 }
 0xb00   :  { %v1404_v44 = vmul.f32 %v2863_v55, %v2859_v28  ;;  %v2658_v28 = vpack.c.bf16 %v1652_v10, %v1648_v37  ;;  %v1659_v55 = vld [vmem:[#allocation11 + $0xd8] sm:$0xff]  ;;  %v1680_v37 = vld [vmem:[#allocation11 + $0x180] sm:$0xff]  ;;  %v1682_v10 = vld [vmem:[#allocation11 + $0x190] sm:$0xff] }
 0xb02   :  { %2498 = vmatprep.mubr.msk.f32.mxu1 %vm531_vm4, %v1404_v44  ;;  %v2660_v44 = vpack.c.bf16 %v1661_v54, %v1657_v53  ;;  %v1692_v53 = vld [vmem:[#allocation11 + $0x1e0] sm:$0xff]  ;;  %v1690_v54 = vld [vmem:[#allocation11 + $0x1d0] sm:$0xff] }
 0xb03   :  { %v2865_v56 = vpop.eup %2864 }
 0xb04   :  { %v1406_v57 = vmul.f32 %v2865_v56, %v2861_v46  ;;  %v1663_v56 = vld [vmem:[#allocation11 + $0xf8] sm:$0xff] }
 0xb06   :  { %2499 = vmatmul.mubr.msk.f32.vlgmr.msra.gmra.mrb[14].mxu1 %vm531_vm4, %v1406_v57  ;;  %v1656_v57 = vld [vmem:[#allocation11 + $0xc0] sm:$0xff] }
 0xb07   :  { %1782 = vmatprep.mubr.f32.mxu1 %v3101_v6  ;;  %2651 = vmatpush1.bf16.msra.mxu1 %v2650_v61  ;;  %v1666_v61 = vld [vmem:[#allocation11 + $0x110] sm:$0xff] }
 0xbd9   :  { %v2500_v59 = vpop.f32.mrb[14].mxu1 }
 0xbda   :  { %v1485_v60 = vpop.f32.mrb[15].mxu1 }
 0xbdb   :  { %2509 = vmatprep.mubr.msk.f32.mxu0 %vm443_vm0, %v1485_v60  ;;  %v2692_v60 = vpack.c.bf16 %v1663_v56, %v1659_v55  ;;  %v1694_v55 = vld [vmem:[#allocation11 + $0x1f0] sm:$0xff] }
 0xbdc   :  { %2510 = vmatmul.mubr.msk.f32.vlgmr.msra.gmra.mrb[6].mxu0 %vm443_vm0, %v2500_v59  ;;  %v1660_v59 = vld [vmem:[#allocation11 + $0xe0] sm:$0xff]  ;;  %v2710_v56 = vpack.c.bf16 %v1694_v55, %v1690_v54  ;;  %v1990_v54 = vld [vmem:[#allocation13 + $0x1b0] sm:$0xff] }
 0xbdd   :  { %1859 = vmatprep.mubr.f32.mxu0 %v3101_v6 }
 0xcaf   :  { %v2511_v49 = vpop.f32.mrb[6].mxu0 }
 0xcb0   :  { %v1570_v2 = vpop.f32.mrb[7].mxu0  ;;  %v1582_v4 = vadd.f32 %v2511_v49, %v3287_v1  ;;  %v1641_v1 = vld [vmem:[#allocation11 + $0x48] sm:$0xff]  ;;  %v2662_v49 = vpack.c.bf16 %v1660_v59, %v1656_v57 }
 0xcb1   :  { %v1581_v3 = vadd.f32 %v1570_v2, %v3284_v0  ;;  %v1634_v0 = vld [vmem:[#allocation11 + $0x10] sm:$0xff]  ;;  %v2652_v23 = vpack.c.bf16 %v1645_v20, %v1641_v1  ;;  %v1673_v1 = vld [vmem:[#allocation11 + $0x148] sm:$0xff]  ;;  %v1675_v20 = vld [vmem:[#allocation11 + $0x158] sm:$0xff] }
 0xcb2   :  { %v3444_v7 = vadd.f32 %v2215_v63, %v1582_v4  ;;  %v2682_v19 = vpack.c.bf16 %v1638_v18, %v1634_v0  ;;  %v1662_v2 = vld [vmem:[#allocation11 + $0xf0] sm:$0xff]  ;;  %v1665_v4 = vld [vmem:[#allocation11 + $0x108] sm:$0xff]  ;;  %v2700_v25 = vpack.c.bf16 %v1679_v22, %v1675_v20 }
 0xcb3   :  { %v3441_v5 = vadd.f32 %v2215_v63, %v1581_v3  ;;  %2653 = vmatprep.subr.bf16.mxu1 %v2652_v23  ;;  %v1658_v63 = vld [vmem:[#allocation11 + $0xd0] sm:$0xff]  ;;  %v2664_v12 = vpack.c.bf16 %v1669_v8, %v1665_v4  ;;  %v1672_v23 = vld [vmem:[#allocation11 + $0x140] sm:$0xff]  ;;  %v2216_v4 = vld [vmem:[%s3524_s7] ss:$0 sm:$0xff] }
 0xcb4   :  { %2683 = vmatpush1.bf16.msra.mxu0 %v2682_v19  ;;  %2655 = vmatpush1.bf16.msra.mxu1 %v2654_v29  ;;  %v2694_v3 = vpack.c.bf16 %v1662_v2, %v1658_v63  ;;  %v1670_v0 = vld [vmem:[#allocation11 + $0x130] sm:$0xff]  ;;  %v1677_v19 = vld [vmem:[#allocation11 + $0x168] sm:$0xff] }
 0xcb5   :  { %1594 = vadd.xlane.f32.xlu0 %v3441_v5  ;;  %2685 = vmatprep.subr.bf16.mxu0 %v2684_v24  ;;  %v2698_v18 = vpack.c.bf16 %v1670_v0, %v1666_v61  ;;  %v2668_v21 = vpack.c.bf16 %v1677_v19, %v1673_v1  ;;  %v1676_v24 = vld [vmem:[#allocation11 + $0x160] sm:$0xff]  ;;  %v1678_v29 = vld [vmem:[#allocation11 + $0x170] sm:$0xff]  ;;  %v1953_v61 = vld [vmem:[#allocation13 + $0x88] sm:$0xff] }
 0xcb6   :  { %2657 = vmatprep.subr.bf16.mxu1 %v2656_v34  ;;  %v2670_v26 = vpack.c.bf16 %v1676_v24, %v1672_v23  ;;  %v2702_v30 = vpack.c.bf16 %v1678_v29, %v1674_v27  ;;  %v1687_v34 = vld [vmem:[#allocation11 + $0x1b8] sm:$0xff]  ;;  %v1984_v0 = vld [vmem:[#allocation13 + $0x180] sm:$0xff]  ;;  %v1985_v1 = vld [vmem:[#allocation13 + $0x188] sm:$0xff] }
 0xcb7   :  { %v1936_v19 = vld [vmem:[#allocation13] sm:$0xff]  ;;  %v1937_v20 = vld [vmem:[#allocation13 + $0x8] sm:$0xff]  ;;  %v1987_v29 = vld [vmem:[#allocation13 + $0x198] sm:$0xff] }
 0xcb8   :  { %2687 = vmatpush1.bf16.msra.mxu0 %v2686_v33  ;;  %2659 = vmatpush1.bf16.msra.mxu1 %v2658_v28  ;;  %v1683_v33 = vld [vmem:[#allocation11 + $0x198] sm:$0xff]  ;;  %v1689_v28 = vld [vmem:[#allocation11 + $0x1c8] sm:$0xff]  ;;  %v2714_v22 = vpack.c.bf16 %v1937_v20, %v1936_v19 }
 0xcb9   :  { %1596 = vadd.xlane.f32.xlu0 %v3444_v7  ;;  %2689 = vmatprep.subr.bf16.mxu0 %v2688_v38  ;;  %v2704_v36 = vpack.c.bf16 %v1687_v34, %v1683_v33  ;;  %v1684_v38 = vld [vmem:[#allocation11 + $0x1a0] sm:$0xff]  ;;  %v1969_v23 = vld [vmem:[#allocation13 + $0x108] sm:$0xff]  ;;  %v1970_v34 = vld [vmem:[#allocation13 + $0x110] sm:$0xff] }
 0xcba   :  { %2661 = vmatprep.subr.bf16.mxu1 %v2660_v44  ;;  %v2674_v39 = vpack.c.bf16 %v1684_v38, %v1680_v37  ;;  %v1956_v37 = vld [vmem:[#allocation13 + $0xa0] sm:$0xff]  ;;  %v1957_v38 = vld [vmem:[#allocation13 + $0xa8] sm:$0xff]  ;;  %v1995_v20 = vld [vmem:[#allocation13 + $0x1d8] sm:$0xff] }
 0xcbc   :  { %2691 = vmatpush1.bf16.msra.mxu0 %v2690_v32  ;;  %2663 = vmatpush1.bf16.msra.mxu1 %v2662_v49  ;;  %v1693_v32 = vld [vmem:[#allocation11 + $0x1e8] sm:$0xff] }
 0xcbd   :  { %2693 = vmatprep.subr.bf16.mxu0 %v2692_v60  ;;  %2665 = vmatprep.subr.bf16.mxu1 %v2664_v12 }
 0xcc0   :  { %2695 = vmatpush1.bf16.msra.mxu0 %v2694_v3  ;;  %2667 = vmatpush1.bf16.msra.mxu1 %v2666_v17 }
 0xcc1   :  { %2697 = vmatprep.subr.bf16.mxu0 %v2696_v16  ;;  %2669 = vmatprep.subr.bf16.mxu1 %v2668_v21  ;;  %v2744_v21 = vpack.c.bf16 %v1985_v1, %v1984_v0  ;;  %v1962_v0 = vld [vmem:[#allocation13 + $0xd0] sm:$0xff] }
 0xcc2   :  { %v1994_v1 = vld [vmem:[#allocation13 + $0x1d0] sm:$0xff] }
 0xcc4   :  { %2699 = vmatpush1.bf16.msra.mxu0 %v2698_v18  ;;  %2671 = vmatpush1.bf16.msra.mxu1 %v2670_v26  ;;  %v1986_v26 = vld [vmem:[#allocation13 + $0x190] sm:$0xff] }
 0xcc5   :  { %2701 = vmatprep.subr.bf16.mxu0 %v2700_v25  ;;  %2673 = vmatprep.subr.bf16.mxu1 %v2672_v35  ;;  %v1954_v25 = vld [vmem:[#allocation13 + $0x90] sm:$0xff]  ;;  %v2748_v31 = vpack.c.bf16 %v1987_v29, %v1986_v26  ;;  %v1971_v35 = vld [vmem:[#allocation13 + $0x118] sm:$0xff]  ;;  %v1964_v26 = vld [vmem:[#allocation13 + $0xe0] sm:$0xff] }
 0xcc6   :  { %v1996_v29 = vld [vmem:[#allocation13 + $0x1e0] sm:$0xff] }
 0xcc8   :  { %2703 = vmatpush1.bf16.msra.mxu0 %v2702_v30  ;;  %2675 = vmatpush1.bf16.msra.mxu1 %v2674_v39  ;;  %v1939_v30 = vld [vmem:[#allocation13 + $0x18] sm:$0xff]  ;;  %v2720_v39 = vpack.c.bf16 %v1957_v38, %v1956_v37  ;;  %v1981_v37 = vld [vmem:[#allocation13 + $0x168] sm:$0xff] }
 0xcc9   :  { %2705 = vmatprep.subr.bf16.mxu0 %v2704_v36  ;;  %v2718_v33 = vpack.c.bf16 %v1939_v30, %v1938_v58  ;;  %v2750_v36 = vpack.c.bf16 %v1971_v35, %v1970_v34  ;;  %v1997_v30 = vld [vmem:[#allocation13 + $0x1e8] sm:$0xff] }
 0xcca   :  { %v2768_v34 = vpack.c.bf16 %v1997_v30, %v1996_v29 }
 0xd42   :  { %v1595_v46 = vpop.xlane.xlu0 %1594 }
 0xd43   :  { %v1598_v62 = vmul.f32 0.0078125, %v1595_v46  ;;  %v2706_v46 = vpack.c.bf16 %v1686_v11, %v1682_v10  ;;  %v1988_v10 = vld [vmem:[#allocation13 + $0x1a0] sm:$0xff]  ;;  %v1989_v11 = vld [vmem:[#allocation13 + $0x1a8] sm:$0xff] }
 0xd45   :  { %v3448_v47 = vsub.f32 %v3441_v5, %v1598_v62  ;;  %v2676_v62 = vpack.c.bf16 %v1693_v32, %v1689_v28  ;;  %2707 = vmatpush1.bf16.msra.mxu0 %v2706_v46  ;;  %v1940_v28 = vld [vmem:[#allocation13 + $0x20] sm:$0xff]  ;;  %v1941_v32 = vld [vmem:[#allocation13 + $0x28] sm:$0xff]  ;;  %v2752_v46 = vpack.c.bf16 %v1989_v11, %v1988_v10  ;;  %v1966_v10 = vld [vmem:[#allocation13 + $0xf0] sm:$0xff] }
 0xd46   :  { %v1597_v48 = vpop.xlane.xlu0 %1596  ;;  %v1998_v11 = vld [vmem:[#allocation13 + $0x1f0] sm:$0xff] }
 0xd47   :  { %v1599_v50 = vmul.f32 0.0078125, %v1597_v48  ;;  %v1602_v45 = vmul.f32 %v3448_v47, %v3448_v47  ;;  %v1691_v48 = vld [vmem:[#allocation11 + $0x1d8] sm:$0xff]  ;;  %2677 = vmatprep.subr.bf16.mxu1 %v2676_v62  ;;  %v2722_v62 = vpack.c.bf16 %v1941_v32, %v1940_v28 }
 0xd48   :  { %v1999_v32 = vld [vmem:[#allocation13 + $0x1f8] sm:$0xff] }
 0xd49   :  { %v3453_v51 = vsub.f32 %v3444_v7, %v1599_v50  ;;  %1604 = vadd.xlane.f32.xlu0 %v1602_v45  ;;  %v1695_v50 = vld [vmem:[#allocation11 + $0x1f8] sm:$0xff]  ;;  %v1688_v45 = vld [vmem:[#allocation11 + $0x1c0] sm:$0xff] }
 0xd4a   :  { %v2678_v44 = vpack.c.bf16 %v1692_v53, %v1688_v45  ;;  %v1959_v53 = vld [vmem:[#allocation13 + $0xb8] sm:$0xff] }
 0xd4b   :  { %v1603_v52 = vmul.f32 %v3453_v51, %v3453_v51 }
 0xd4c   :  { %2679 = vmatpush1.bf16.msra.mxu1 %v2678_v44  ;;  %v1991_v44 = vld [vmem:[#allocation13 + $0x1b8] sm:$0xff] }
 0xd4d   :  { %1606 = vadd.xlane.f32.xlu0 %v1603_v52  ;;  %v2708_v52 = vpack.c.bf16 %v1695_v50, %v1691_v48  ;;  %v1972_v48 = vld [vmem:[#allocation13 + $0x120] sm:$0xff]  ;;  %v1973_v50 = vld [vmem:[#allocation13 + $0x128] sm:$0xff] }
 0xd4e   :  { %v2754_v45 = vpack.c.bf16 %v1973_v50, %v1972_v48  ;;  %v2772_v48 = vpack.c.bf16 %v1999_v32, %v1998_v11 }
 0xd4f   :  { %2709 = vmatprep.subr.bf16.mxu0 %v2708_v52  ;;  %v1958_v52 = vld [vmem:[#allocation13 + $0xb0] sm:$0xff] }
 0xd50   :  { %2711 = vmatpush1.bf16.msra.mxu0 %v2710_v56  ;;  %v2724_v55 = vpack.c.bf16 %v1959_v53, %v1958_v52  ;;  %v1942_v56 = vld [vmem:[#allocation13 + $0x30] sm:$0xff]  ;;  %v1983_v52 = vld [vmem:[#allocation13 + $0x178] sm:$0xff] }
 0xd51   :  { %2745 = vmatprep.subr.bf16.mxu0 %v2744_v21  ;;  %v1946_v21 = vld [vmem:[#allocation13 + $0x50] sm:$0xff] }
 0xdd6   :  { %v1605_v57 = vpop.xlane.xlu0 %1604 }
 0xdd7   :  { %v1608_v59 = vmul.f32 0.0078125, %v1605_v57  ;;  %v1943_v57 = vld [vmem:[#allocation13 + $0x38] sm:$0xff] }
 0xdd9   :  { %v1610_v60 = vadd.f32 1e-05, %v1608_v59  ;;  %v2756_v59 = vpack.c.bf16 %v1991_v44, %v1990_v54  ;;  %v1696_v54 = vld [vmem:[%s3527_s10] sm:$0xf] }
 0xdda   :  { %v1607_v49 = vpop.xlane.xlu0 %1606  ;;  %v1701_v44 = vrot.slane %v1696_v54, %v276_v41 }
 0xddb   :  { %2866 = vrsqrt.f32 %v1610_v60  ;;  %v1609_v63 = vmul.f32 0.0078125, %v1607_v49  ;;  %v2726_v60 = vpack.c.bf16 %v1943_v57, %v1942_v56  ;;  %v1974_v49 = vld [vmem:[#allocation13 + $0x130] sm:$0xff]  ;;  %v1709_v56 = vrot.slane %v1696_v54, %v284_v42 }
 0xddc   :  { %v1705_v57 = vrot.slane %v1696_v54, %v280_v43 }
 0xddd   :  { %v1611_v2 = vadd.f32 1e-05, %v1609_v63  ;;  %v1975_v63 = vld [vmem:[#allocation13 + $0x138] sm:$0xff] }
 0xddf   :  { %2868 = vrsqrt.f32 %v1611_v2  ;;  %v2758_v2 = vpack.c.bf16 %v1975_v63, %v1974_v49 }
 0xde5   :  { %v2867_v3 = vpop.eup %2866 }
 0xde6   :  { %v1614_v8 = vmul.f32 %v2867_v3, %v3448_v47  ;;  %v1952_v47 = vld [vmem:[#allocation13 + $0x80] sm:$0xff] }
 0xde7   :  { %v2712_v18 = vpack.c.bf16 %v1953_v61, %v1952_v47  ;;  %v1960_v3 = vld [vmem:[#allocation13 + $0xc0] sm:$0xff]  ;;  %v1977_v47 = vld [vmem:[#allocation13 + $0x148] sm:$0xff] }
 0xde8   :  { %v1622_v12 = vmul.f32 %v2216_v4, %v1614_v8  ;;  %v1992_v8 = vld [vmem:[#allocation13 + $0x1c0] sm:$0xff] }
 0xde9   :  { %v2869_v13 = vpop.eup %2868  ;;  %2713 = vmatprep.subr.bf16.mxu1 %v2712_v18  ;;  %v1963_v18 = vld [vmem:[#allocation13 + $0xd8] sm:$0xff] }
 0xdea   :  { %v1630_v14 = vadd.f32 %v2217_v9, %v1622_v12  ;;  %v1615_v15 = vmul.f32 %v2869_v13, %v3453_v51  ;;  %v1968_v51 = vld [vmem:[#allocation13 + $0x100] sm:$0xff]  ;;  %v1993_v12 = vld [vmem:[#allocation13 + $0x1c8] sm:$0xff]  ;;  %v2732_v19 = vpack.c.bf16 %v1963_v18, %v1962_v0 }
 0xdeb   :  { %v2746_v24 = vpack.c.bf16 %v1969_v23, %v1968_v51  ;;  %v1944_v13 = vld [vmem:[#allocation13 + $0x40] sm:$0xff]  ;;  %v2764_v51 = vpack.c.bf16 %v1995_v20, %v1994_v1 }
 0xdec   :  { %1783 = vmatmul.mubr.f32.vlgmr.msra.gmra.mrb[16].mxu1 %v1630_v14  ;;  %1860 = vmatmul.mubr.f32.vlgmr.msra.gmra.mrb[8].mxu0 %v1630_v14  ;;  %v1623_v16 = vmul.f32 %v2216_v4, %v1615_v15  ;;  %v1961_v4 = vld [vmem:[#allocation13 + $0xc8] sm:$0xff]  ;;  %v2760_v15 = vpack.c.bf16 %v1993_v12, %v1992_v8 }
 0xded   :  { %1788 = vmatprep.mubr.f32.mxu1 %v3101_v6  ;;  %1865 = vmatprep.mubr.f32.mxu0 %v3101_v6  ;;  %v1955_v6 = vld [vmem:[#allocation13 + $0x98] sm:$0xff]  ;;  %v1945_v14 = vld [vmem:[#allocation13 + $0x48] sm:$0xff] }
 0xdee   :  { %v1631_v17 = vadd.f32 %v2217_v9, %v1623_v16  ;;  %2715 = vmatpush3.bf16.msra.mxu1 %v2714_v22  ;;  %2747 = vmatpush3.bf16.msra.mxu0 %v2746_v24  ;;  %v2716_v27 = vpack.c.bf16 %v1955_v6, %v1954_v25  ;;  %v2728_v9 = vpack.c.bf16 %v1961_v4, %v1960_v3  ;;  %v1947_v22 = vld [vmem:[#allocation13 + $0x58] sm:$0xff]  ;;  %v1978_v24 = vld [vmem:[#allocation13 + $0x150] sm:$0xff] }
 0xdef   :  { %2749 = vmatprep.subr.bf16.mxu0 %v2748_v31  ;;  %v2730_v16 = vpack.c.bf16 %v1945_v14, %v1944_v13  ;;  %v2734_v23 = vpack.c.bf16 %v1947_v22, %v1946_v21  ;;  %v1979_v25 = vld [vmem:[#allocation13 + $0x158] sm:$0xff]  ;;  %v1948_v31 = vld [vmem:[#allocation13 + $0x60] sm:$0xff] }
 0xdf0   :  { %1789 = vmatmul.mubr.f32.gmra.mrb[18].mxu1 %v1631_v17  ;;  %1866 = vmatmul.mubr.f32.gmra.mrb[10].mxu0 %v1631_v17  ;;  %v1976_v17 = vld [vmem:[#allocation13 + $0x140] sm:$0xff]  ;;  %v2766_v6 = vpack.c.bf16 %v1979_v25, %v1978_v24 }
 0xdf1   :  { %2717 = vmatprep.subr.bf16.mxu1 %v2716_v27  ;;  %v2762_v61 = vpack.c.bf16 %v1977_v47, %v1976_v17  ;;  %v1965_v27 = vld [vmem:[#allocation13 + $0xe8] sm:$0xff] }
 0xdf2   :  { %2719 = vmatpush3.bf16.msra.mxu1 %v2718_v33  ;;  %2751 = vmatpush3.bf16.msra.mxu0 %v2750_v36  ;;  %v2736_v58 = vpack.c.bf16 %v1965_v27, %v1964_v26  ;;  %v1949_v33 = vld [vmem:[#allocation13 + $0x68] sm:$0xff]  ;;  %v1980_v36 = vld [vmem:[#allocation13 + $0x160] sm:$0xff] }
 0xdf3   :  { %2721 = vmatprep.subr.bf16.mxu1 %v2720_v39  ;;  %2753 = vmatprep.subr.bf16.mxu0 %v2752_v46  ;;  %v2738_v35 = vpack.c.bf16 %v1949_v33, %v1948_v31  ;;  %v2770_v38 = vpack.c.bf16 %v1981_v37, %v1980_v36  ;;  %v1967_v39 = vld [vmem:[#allocation13 + $0xf8] sm:$0xff]  ;;  %v1950_v46 = vld [vmem:[#allocation13 + $0x70] sm:$0xff] }
 0xdf4   :  { %v2740_v28 = vpack.c.bf16 %v1967_v39, %v1966_v10 }
 0xdf6   :  { %2723 = vmatpush3.bf16.msra.mxu1 %v2722_v62  ;;  %2755 = vmatpush3.bf16.msra.mxu0 %v2754_v45  ;;  %v1951_v62 = vld [vmem:[#allocation13 + $0x78] sm:$0xff]  ;;  %v1982_v45 = vld [vmem:[#allocation13 + $0x170] sm:$0xff] }
 0xdf7   :  { %2725 = vmatprep.subr.bf16.mxu1 %v2724_v55  ;;  %2757 = vmatprep.subr.bf16.mxu0 %v2756_v59  ;;  %v2742_v50 = vpack.c.bf16 %v1951_v62, %v1950_v46  ;;  %v2774_v53 = vpack.c.bf16 %v1983_v52, %v1982_v45  ;;  %v1712_v55 = vsub.s32 3, %v3304_v40 }
 0xdf9   :  { %v1713_v59 = vrot.slane %v1696_v54, %v1712_v55 }
 0xdfa   :  { %2727 = vmatpush3.bf16.msra.mxu1 %v2726_v60  ;;  %2759 = vmatpush3.bf16.msra.mxu0 %v2758_v2 }
 0xdfb   :  { %2729 = vmatprep.subr.bf16.mxu1 %v2728_v9  ;;  %2761 = vmatprep.subr.bf16.mxu0 %v2760_v15 }
 0xdfe   :  { %2731 = vmatpush3.bf16.msra.mxu1 %v2730_v16  ;;  %2763 = vmatpush3.bf16.msra.mxu0 %v2762_v61 }
 0xdff   :  { %2733 = vmatprep.subr.bf16.mxu1 %v2732_v19  ;;  %2765 = vmatprep.subr.bf16.mxu0 %v2764_v51 }
 0xe02   :  { %2735 = vmatpush3.bf16.msra.mxu1 %v2734_v23  ;;  %2767 = vmatpush3.bf16.msra.mxu0 %v2766_v6 }
 0xe03   :  { %2737 = vmatprep.subr.bf16.mxu1 %v2736_v58  ;;  %2769 = vmatprep.subr.bf16.mxu0 %v2768_v34 }
 0xe06   :  { %2739 = vmatpush3.bf16.msra.mxu1 %v2738_v35  ;;  %2771 = vmatpush3.bf16.msra.mxu0 %v2770_v38 }
 0xe07   :  { %2741 = vmatprep.subr.bf16.mxu1 %v2740_v28  ;;  %2773 = vmatprep.subr.bf16.mxu0 %v2772_v48 }
 0xe0a   :  { %2743 = vmatpush3.bf16.msra.mxu1 %v2742_v50  ;;  %2775 = vmatpush3.bf16.msra.mxu0 %v2774_v53 }
 0xebf   :  { %v1784_v60 = vpop.f32.mrb[16].mxu1  ;;  %v1861_v49 = vpop.f32.mrb[8].mxu0 }
 0xec0   :  { %v3477_v63 = vadd.f32 %v1784_v60, %v1701_v44  ;;  %v3479_v2 = vadd.f32 %v1861_v49, %v1709_v56  ;;  %v1786_v3 = vpop.f32.mrb[17].mxu1  ;;  %v1863_v4 = vpop.f32.mrb[9].mxu0 }
 0xec1   :  { %v1787_v8 = vadd.f32 %v1786_v3, %v1705_v57  ;;  %v3481_v9 = vadd.f32 %v1863_v4, %v1713_v59 }
 0xec2   :  { %v2218_v41 = vmul.f32 -1.702, %v3477_v63  ;;  %v2220_v12 = vmul.f32 -1.702, %v3479_v2 }
 0xec3   :  { %v2219_v42 = vmul.f32 -1.702, %v1787_v8  ;;  %v2221_v40 = vmul.f32 -1.702, %v3481_v9  ;;  %v1790_v43 = vpop.f32.mrb[18].mxu1  ;;  %v1867_v13 = vpop.f32.mrb[10].mxu0 }
 0xec4   :  { %v1888_v14 = vmul.f32 1.442695, %v2218_v41  ;;  %v1892_v15 = vmul.f32 1.442695, %v2220_v12  ;;  %v3486_v16 = vadd.f32 %v1790_v43, %v1701_v44  ;;  %v3488_v17 = vadd.f32 %v1867_v13, %v1709_v56  ;;  %v1792_v47 = vpop.f32.mrb[19].mxu1  ;;  %v1869_v61 = vpop.f32.mrb[11].mxu0 }
 0xec5   :  { %v1890_v0 = vmul.f32 1.442695, %v2219_v42  ;;  %v1894_v18 = vmul.f32 1.442695, %v2221_v40  ;;  %v1793_v1 = vadd.f32 %v1792_v47, %v1705_v57  ;;  %v1870_v19 = vadd.f32 %v1869_v61, %v1713_v59 }
 0xec6   :  { %2870 = vpow2.f32 %v1888_v14  ;;  %v2222_v20 = vmul.f32 -1.702, %v3486_v16  ;;  %v2224_v21 = vmul.f32 -1.702, %v3488_v17 }
 0xec7   :  { %2872 = vpow2.f32 %v1892_v15  ;;  %v2223_v22 = vmul.f32 -1.702, %v1793_v1  ;;  %v2225_v51 = vmul.f32 -1.702, %v1870_v19 }
 0xec8   :  { %2874 = vpow2.f32 %v1890_v0  ;;  %v1896_v23 = vmul.f32 1.442695, %v2222_v20  ;;  %v1900_v24 = vmul.f32 1.442695, %v2224_v21 }
 0xec9   :  { %2876 = vpow2.f32 %v1894_v18  ;;  %v1898_v25 = vmul.f32 1.442695, %v2223_v22  ;;  %v1902_v6 = vmul.f32 1.442695, %v2225_v51 }
 0xeca   :  { %2878 = vpow2.f32 %v1896_v23 }
 0xecb   :  { %2880 = vpow2.f32 %v1900_v24 }
 0xecc   :  { %2882 = vpow2.f32 %v1898_v25 }
 0xecd   :  { %2884 = vpow2.f32 %v1902_v6 }
 0xed0   :  { %v2871_v26 = vpop.eup %2870 }
 0xed1   :  { %v2873_v27 = vpop.eup %2872  ;;  %v1904_v29 = vadd.f32 1.0, %v2871_v26 }
 0xed2   :  { %v2875_v58 = vpop.eup %2874  ;;  %v1906_v30 = vadd.f32 1.0, %v2873_v27 }
 0xed3   :  { %v2877_v31 = vpop.eup %2876  ;;  %2886 = vrcp.f32 %v1904_v29  ;;  %v1905_v33 = vadd.f32 1.0, %v2875_v58 }
 0xed4   :  { %v2879_v34 = vpop.eup %2878  ;;  %2888 = vrcp.f32 %v1906_v30  ;;  %v1907_v35 = vadd.f32 1.0, %v2877_v31 }
 0xed5   :  { %v2881_v36 = vpop.eup %2880  ;;  %2890 = vrcp.f32 %v1905_v33  ;;  %v1908_v37 = vadd.f32 1.0, %v2879_v34 }
 0xed6   :  { %v2883_v38 = vpop.eup %2882  ;;  %2892 = vrcp.f32 %v1907_v35  ;;  %v1910_v10 = vadd.f32 1.0, %v2881_v36 }
 0xed7   :  { %v2885_v39 = vpop.eup %2884  ;;  %2894 = vrcp.f32 %v1908_v37  ;;  %v1909_v11 = vadd.f32 1.0, %v2883_v38 }
 0xed8   :  { %2896 = vrcp.f32 %v1910_v10  ;;  %v1911_v28 = vadd.f32 1.0, %v2885_v39 }
 0xed9   :  { %2898 = vrcp.f32 %v1909_v11 }
 0xeda   :  { %2900 = vrcp.f32 %v1911_v28 }
 0xedd   :  { %v2887_v32 = vpop.eup %2886 }
 0xede   :  { %v2889_v46 = vpop.eup %2888  ;;  %v1928_v52 = vmul.f32 %v2887_v32, %v3477_v63 }
 0xedf   :  { %v2891_v62 = vpop.eup %2890  ;;  %v1930_v55 = vmul.f32 %v2889_v46, %v3479_v2  ;;  %v2226_v2 = vld [vmem:[%s3529_s12] ss:$0 sm:$0xff]  ;;  %s3056_s12 = scalar_lea.vmem %s2167_s16, 256 }
 0xee0   :  { %v2893_v48 = vpop.eup %2892  ;;  %v1929_v50 = vmul.f32 %v2891_v62, %v1787_v8  ;;  %p3057_p0 = scmp.ne.s32.totalorder %s2167_s16, %s3056_s12  ;;  %p3062_p2 = scmp.lt.s32.totalorder %s3056_s12, %s3056_s12 }
 0xee1   :  { %v2895_v45 = vpop.eup %2894  ;;  %v1931_v53 = vmul.f32 %v2893_v48, %v3481_v9 }
 0xee2   :  { %v2897_v54 = vpop.eup %2896  ;;  %2071 = vmatprep.mubr.f32.mxu1 %v1929_v50  ;;  %v1932_v59 = vmul.f32 %v2895_v45, %v3486_v16  ;;  %p3063_p3 = por %p3062_p2, %p3061_p1 }
 0xee3   :  { %v2899_v44 = vpop.eup %2898  ;;  %2146 = vmatprep.mubr.f32.mxu0 %v1931_v53  ;;  %2072 = vmatmul.mubr.f32.vlgmr.msra.gmra.mrb[20].mxu1 %v1928_v52  ;;  %v1934_v49 = vmul.f32 %v2897_v54, %v3488_v17 }
 0xee4   :  { %v2901_v56 = vpop.eup %2900  ;;  %v1933_v57 = vmul.f32 %v2899_v44, %v1793_v1  ;;  %2147 = vmatmul.mubr.f32.vlgmr.msra.gmra.mrb[12].mxu0 %v1930_v55  ;;  %p3064_p4 = pnand %p3063_p3, %p3057_p0 }
 0xee5   :  { %v1935_v60 = vmul.f32 %v2901_v56, %v1870_v19 }
 0xee6   :  { %2076 = vmatprep.mubr.f32.mxu1 %v1933_v57 }
 0xee7   :  { %2151 = vmatprep.mubr.f32.mxu0 %v1935_v60  ;;  %2077 = vmatmul.mubr.f32.gmra.mrb[22].mxu1 %v1932_v59 }
 0xee8   :  { %2152 = vmatmul.mubr.f32.gmra.mrb[14].mxu0 %v1934_v49 }
 0xfb6   :  { %v2333_v63 = vpop.f32.mrb[20].mxu1 }
 0xfb7   :  { %v2371_v3 = vpop.f32.mrb[12].mxu0  ;;  %v2334_v4 = vpop.f32.mrb[21].mxu1 }
 0xfb8   :  { %v2335_v8 = vadd.f32 %v2334_v4, %v2333_v63  ;;  %v2372_v9 = vpop.f32.mrb[13].mxu0 }
 0xfb9   :  { %v2373_v41 = vadd.f32 %v2372_v9, %v2371_v3 }
 0xfba   :  { %v2074_v12 = vadd.f32 %v2335_v8, %v2226_v2  ;;  %v2336_v42 = vpop.f32.mrb[22].mxu1 }
 0xfbb   :  { %v2374_v40 = vpop.f32.mrb[14].mxu0  ;;  %v2337_v43 = vpop.f32.mrb[23].mxu1 }
 0xfbc   :  { %v2149_v13 = vadd.f32 %v2373_v41, %v2074_v12  ;;  %v2338_v14 = vadd.f32 %v2337_v43, %v2336_v42  ;;  %v2375_v15 = vpop.f32.mrb[15].mxu0 }
 0xfbd   :  { %v2376_v16 = vadd.f32 %v2375_v15, %v2374_v40 }
 0xfbe   :  { %v2157_v17 = vadd.f32 %v2149_v13, %v3441_v5  ;;  %v2079_v47 = vadd.f32 %v2338_v14, %v2226_v2 }
 0xfc0   :  { %2159 = vst [vmem:[#allocation14] sm:$0xff] %v2157_v17  ;;  %v2154_v61 = vadd.f32 %v2376_v16, %v2079_v47 }
 0xfc2   :  { %v2158_v0 = vadd.f32 %v2154_v61, %v3444_v7 }
 0xfc4   :  { %2160 = vst [vmem:[#allocation14 + $0x8] sm:$0xff] %v2158_v0 }
 0xfc5   :  { %3067 = shalt.err (!%p3064_p4)
}
 0xfc6   :  { %s3068_s20 = scalar_lea.hbm %s3530_s13, 256 }
 0xfc7   :  { %p3069_p5 = scmp.ne.s32.totalorder %s3530_s13, %s3068_s20  ;;  %p3072_p6 = scmp.lt.u32.totalorder %s3068_s20, %s3530_s13 }
 0xfc9   :  { %p3074_p7 = pnand %p3072_p6, %p3069_p5 }
 0xfcb   :  { %3077 = shalt.err (!%p3074_p7)
}
 0xfcc   :  { %2172 = dma.vmem_to_hbm [thread:$0]  %s2167_s16, 256, %s3530_s13, [#allocation4], %s3096_s9, %s3096_s9, %s3097_s19  }
 0xfcd   :  { %3086 = dma.done.wait [#allocation4], 256  }
 0xfce   :  { %3087 = vsyncadd [#allocation4], 4294967040 }
 0xfcf   :  { %2176 = vsyncpa [#allocation3], 1 }
 0xfd0   :  { %2177 = vsyncpa [#allocation6], 1 }
 0xfd1   :  { %2178 = vsyncpa [#allocation9], 1 }
 0xfd2   :  { %2179 = vsyncpa [#allocation12], 1 }
 0xfd3   :  { %2180 = vsyncpa [#allocation4], 1 }

</bundles_post_ra>
